<compile_context>
chip_gen: v6e
topology: v6e:2x2x1
jax: 0.10.0
libtpu: 0.0.40
codegen_flags: <defaults>
</compile_context>

<pallas_src>
import jax
import jax.numpy as jnp
import numpy as np
from jax.experimental import pallas as pl
from jax.experimental.pallas import tpu as pltpu


def _self_attn_kernel(x_ref, wqT_ref, bq_ref, wkT_ref, bk_ref, wv_ref, bv_ref,
                      gamma_ref, out_ref, attn_ref):
    # x_ref block: (1, C, N)  -- one image, channels x flattened-spatial (lane-dense)
    x = x_ref[0]                                      # (C, N)
    xt = x.T                                          # (N, C)  one cheap XLU transpose

    # 1x1 convs == channel matmuls (one MXU call each per grid step)
    q = jnp.dot(xt, wqT_ref[...], preferred_element_type=jnp.float32) + bq_ref[...]   # (N, C8)
    k = jnp.dot(xt, wkT_ref[...], preferred_element_type=jnp.float32) + bk_ref[...]   # (N, C8)
    v = jnp.dot(wv_ref[...], x, preferred_element_type=jnp.float32) + bv_ref[...]     # (C, N)

    # energy[i, j] = sum_c q[i, c] * k[j, c]   (== proj_query @ proj_key), A @ B^T
    energy = jax.lax.dot_general(q, k, (((1,), (1,)), ((), ())),
                                 preferred_element_type=jnp.float32)                  # (N, N)

    # row softmax (max-subtracted); reciprocal on the EUP
    m = jnp.max(energy, axis=-1, keepdims=True)
    p = jnp.exp(energy - m)
    denom = jnp.sum(p, axis=-1, keepdims=True)
    attn = p * pl.reciprocal(denom, approx=True)                                      # (N, N)

    # out[c, i] = sum_j v[c, j] * attn[i, j]   (== proj_value @ attention^T), A @ B^T
    out_v = jax.lax.dot_general(v, attn, (((1,), (1,)), ((), ())),
                                preferred_element_type=jnp.float32)                   # (C, N)

    gamma = gamma_ref[0, 0]
    out_ref[0] = (gamma * out_v + x).astype(out_ref.dtype)
    attn_ref[0] = attn.astype(attn_ref.dtype)


def self_attn_forward(x, wq, bq, wk, bk, wv, bv, gamma):
    """Pallas port of Self_Attn.forward.

    x: (B, C, W, H) float32
    wq, wk: (C//8, C); wv: (C, C); bq, bk: (C//8,); bv: (C,); gamma: scalar.
    Returns (out: (B, C, W, H), attention: (B, N, N)) with N = W*H.
    """
    B, C, W, H = x.shape
    N = W * H
    C8 = wq.shape[0]

    x_flat = x.reshape(B, C, N)

    # Pre-transpose / reshape params once in the wrapper; constant index_maps keep
    # them resident in VMEM across all grid steps (no per-step regeneration).
    wqT = jnp.asarray(wq, jnp.float32).T            # (C, C8)
    wkT = jnp.asarray(wk, jnp.float32).T            # (C, C8)
    wv2 = jnp.asarray(wv, jnp.float32)              # (C, C)
    bq2 = jnp.asarray(bq, jnp.float32).reshape(1, C8)
    bk2 = jnp.asarray(bk, jnp.float32).reshape(1, C8)
    bv2 = jnp.asarray(bv, jnp.float32).reshape(C, 1)
    gamma2 = jnp.asarray(gamma, jnp.float32).reshape(1, 1)

    const2 = lambda b: (0, 0)

    out_flat, attn = pl.pallas_call(
        _self_attn_kernel,
        out_shape=(
            jax.ShapeDtypeStruct((B, C, N), x.dtype),
            jax.ShapeDtypeStruct((B, N, N), jnp.float32),
        ),
        grid=(B,),
        in_specs=[
            pl.BlockSpec((1, C, N), lambda b: (b, 0, 0)),     # x (per-image block)
            pl.BlockSpec((C, C8), const2),                    # Wq^T   (resident)
            pl.BlockSpec((1, C8), const2),                    # bq
            pl.BlockSpec((C, C8), const2),                    # Wk^T
            pl.BlockSpec((1, C8), const2),                    # bk
            pl.BlockSpec((C, C), const2),                     # Wv
            pl.BlockSpec((C, 1), const2),                     # bv
            pl.BlockSpec(memory_space=pltpu.MemorySpace.SMEM),  # gamma scalar
        ],
        out_specs=(
            pl.BlockSpec((1, C, N), lambda b: (b, 0, 0)),     # out  (lane-dense, N lanes)
            pl.BlockSpec((1, N, N), lambda b: (b, 0, 0)),     # attention
        ),
        compiler_params=pltpu.CompilerParams(
            dimension_semantics=("parallel",),                # >=2 steps -> both v7x TCs used
        ),
    )(x_flat, wqT, bq2, wkT, bk2, wv2, bv2, gamma2)

    return out_flat.reshape(B, C, W, H), attn


def _reference(x, wq, bq, wk, bk, wv, bv, gamma):
    # Pure-JAX reference of the PyTorch forward.
    B, C, W, H = x.shape
    N = W * H
    xf = x.reshape(B, C, N).astype(jnp.float32)
    q = jnp.einsum('oc,bcn->bon', wq, xf) + bq[None, :, None]
    k = jnp.einsum('oc,bcn->bon', wk, xf) + bk[None, :, None]
    v = jnp.einsum('oc,bcn->bon', wv, xf) + bv[None, :, None]
    energy = jnp.einsum('bci,bcj->bij', q, k)
    attn = jax.nn.softmax(energy, axis=-1)
    out = jnp.einsum('bcj,bij->bci', v, attn)
    out = gamma * out + xf
    return out.reshape(B, C, W, H), attn


if __name__ == "__main__":
    # Small deterministic test shapes (in_dim must be >= 8: query/key project to C // 8).
    B, C, W, H = 2, 16, 16, 16
    C8 = C // 8
    N = W * H

    key = jax.random.PRNGKey(0)
    kx, kq, kk, kv, kbq, kbk, kbv = jax.random.split(key, 7)

    scale = 0.1
    x = jax.random.normal(kx, (B, C, W, H), dtype=jnp.float32)
    wq = scale * jax.random.normal(kq, (C8, C), dtype=jnp.float32)
    wk = scale * jax.random.normal(kk, (C8, C), dtype=jnp.float32)
    wv = scale * jax.random.normal(kv, (C, C), dtype=jnp.float32)
    bq = scale * jax.random.normal(kbq, (C8,), dtype=jnp.float32)
    bk = scale * jax.random.normal(kbk, (C8,), dtype=jnp.float32)
    bv = scale * jax.random.normal(kbv, (C,), dtype=jnp.float32)
    # Module initializes gamma = 0 (out == x); use a nonzero value to exercise the full path.
    gamma = jnp.float32(0.5)

    out, attn = self_attn_forward(x, wq, bq, wk, bk, wv, bv, gamma)
    out, attn = jax.block_until_ready((out, attn))

    ref_out, ref_attn = _reference(x, wq, bq, wk, bk, wv, bv, gamma)

    assert out.shape == (B, C, W, H)
    assert attn.shape == (B, N, N)
    # softmax rows must sum to ~1 (approx reciprocal is well within this)
    assert np.allclose(np.asarray(attn).sum(-1), 1.0, atol=5e-3)
    assert np.allclose(np.asarray(attn), np.asarray(ref_attn), rtol=2e-2, atol=2e-2)
    assert np.allclose(np.asarray(out), np.asarray(ref_out), rtol=2e-2, atol=2e-2)

    print("KERNEL_OK")
</pallas_src>

<mosaic_0001>
module attributes {stable_mosaic.version = 11 : i64} {
  func.func @_self_attn_kernel(%arg0: i32, %arg1: memref<1x16x256xf32, #tpu.memory_space<vmem>>, %arg2: memref<16x2xf32, #tpu.memory_space<vmem>>, %arg3: memref<1x2xf32, #tpu.memory_space<vmem>>, %arg4: memref<16x2xf32, #tpu.memory_space<vmem>>, %arg5: memref<1x2xf32, #tpu.memory_space<vmem>>, %arg6: memref<16x16xf32, #tpu.memory_space<vmem>>, %arg7: memref<16x1xf32, #tpu.memory_space<vmem>>, %arg8: memref<1x1xf32, #tpu.memory_space<smem>>, %arg9: memref<1x16x256xf32, #tpu.memory_space<vmem>>, %arg10: memref<1x256x256xf32, #tpu.memory_space<vmem>>) attributes {dimension_semantics = [#tpu.dimension_semantics<parallel>], iteration_bounds = array<i64: 2>, scalar_prefetch = 0 : i64, scratch_operands = 0 : i64, tpu.core_type = #tpu.core_type<tc>, window_params = [{transform_indices = @transform_0, window_bounds = array<i64: 1, 16, 256>}, {pipeline_mode = #tpu.pipeline_mode<synchronous>, transform_indices = @transform_1, window_bounds = array<i64: 16, 2>}, {pipeline_mode = #tpu.pipeline_mode<synchronous>, transform_indices = @transform_2, window_bounds = array<i64: 1, 2>}, {pipeline_mode = #tpu.pipeline_mode<synchronous>, transform_indices = @transform_3, window_bounds = array<i64: 16, 2>}, {pipeline_mode = #tpu.pipeline_mode<synchronous>, transform_indices = @transform_4, window_bounds = array<i64: 1, 2>}, {pipeline_mode = #tpu.pipeline_mode<synchronous>, transform_indices = @transform_5, window_bounds = array<i64: 16, 16>}, {pipeline_mode = #tpu.pipeline_mode<synchronous>, transform_indices = @transform_6, window_bounds = array<i64: 16, 1>}, {transform_indices = @transform_7, window_bounds = array<i64: 1, 1>}, {transform_indices = @transform_8, window_bounds = array<i64: 1, 16, 256>}, {transform_indices = @transform_9, window_bounds = array<i64: 1, 256, 256>}]} {
    %c0 = arith.constant 0 : index
    %c0_0 = arith.constant 0 : index
    %c0_1 = arith.constant 0 : index
    %0 = vector.load %arg1[%c0, %c0_0, %c0_1] : memref<1x16x256xf32, #tpu.memory_space<vmem>>, vector<1x16x256xf32>
    %1 = vector.shape_cast %0 : vector<1x16x256xf32> to vector<16x256xf32>
    %2 = tpu.transpose %1, [1, 0] : vector<16x256xf32> -> vector<256x16xf32>
    %c0_2 = arith.constant 0 : index
    %c0_3 = arith.constant 0 : index
    %3 = vector.load %arg2[%c0_2, %c0_3] : memref<16x2xf32, #tpu.memory_space<vmem>>, vector<16x2xf32>
    %cst = arith.constant dense<0.000000e+00> : vector<256x2xf32>
    %4 = tpu.matmul %2, %3, %cst {dimension_numbers = #tpu.dot_dimension_numbers<[1], [0], [0], [1], [0, 0, 1, 1], [], []>} : vector<256x16xf32>, vector<16x2xf32>, vector<256x2xf32> -> vector<256x2xf32>
    %c0_4 = arith.constant 0 : index
    %c0_5 = arith.constant 0 : index
    %5 = vector.load %arg3[%c0_4, %c0_5] : memref<1x2xf32, #tpu.memory_space<vmem>>, vector<1x2xf32>
    %6 = vector.broadcast %5 : vector<1x2xf32> to vector<256x2xf32>
    %7 = arith.addf %4, %6 : vector<256x2xf32>
    %c0_6 = arith.constant 0 : index
    %c0_7 = arith.constant 0 : index
    %8 = vector.load %arg4[%c0_6, %c0_7] : memref<16x2xf32, #tpu.memory_space<vmem>>, vector<16x2xf32>
    %cst_8 = arith.constant dense<0.000000e+00> : vector<256x2xf32>
    %9 = tpu.matmul %2, %8, %cst_8 {dimension_numbers = #tpu.dot_dimension_numbers<[1], [0], [0], [1], [0, 0, 1, 1], [], []>} : vector<256x16xf32>, vector<16x2xf32>, vector<256x2xf32> -> vector<256x2xf32>
    %c0_9 = arith.constant 0 : index
    %c0_10 = arith.constant 0 : index
    %10 = vector.load %arg5[%c0_9, %c0_10] : memref<1x2xf32, #tpu.memory_space<vmem>>, vector<1x2xf32>
    %11 = vector.broadcast %10 : vector<1x2xf32> to vector<256x2xf32>
    %12 = arith.addf %9, %11 : vector<256x2xf32>
    %c0_11 = arith.constant 0 : index
    %c0_12 = arith.constant 0 : index
    %13 = vector.load %arg6[%c0_11, %c0_12] : memref<16x16xf32, #tpu.memory_space<vmem>>, vector<16x16xf32>
    %cst_13 = arith.constant dense<0.000000e+00> : vector<16x256xf32>
    %14 = tpu.matmul %13, %1, %cst_13 {dimension_numbers = #tpu.dot_dimension_numbers<[1], [0], [0], [1], [0, 0, 1, 1], [], []>} : vector<16x16xf32>, vector<16x256xf32>, vector<16x256xf32> -> vector<16x256xf32>
    %c0_14 = arith.constant 0 : index
    %c0_15 = arith.constant 0 : index
    %15 = vector.load %arg7[%c0_14, %c0_15] : memref<16x1xf32, #tpu.memory_space<vmem>>, vector<16x1xf32>
    %16 = vector.broadcast %15 : vector<16x1xf32> to vector<16x256xf32>
    %17 = arith.addf %14, %16 : vector<16x256xf32>
    %cst_16 = arith.constant dense<0.000000e+00> : vector<256x256xf32>
    %18 = tpu.matmul %7, %12, %cst_16 {dimension_numbers = #tpu.dot_dimension_numbers<[1], [1], [0], [0], [0, 0, 1, 0], [], []>} : vector<256x2xf32>, vector<256x2xf32>, vector<256x256xf32> -> vector<256x256xf32>
    %cst_17 = arith.constant dense<0xFF800000> : vector<256xf32>
    %19 = vector.multi_reduction <maximumf>, %18, %cst_17 [1] : vector<256x256xf32> to vector<256xf32>
    %20 = vector.shape_cast %19 : vector<256xf32> to vector<256x1xf32>
    %21 = vector.broadcast %20 : vector<256x1xf32> to vector<256x256xf32>
    %22 = arith.subf %18, %21 : vector<256x256xf32>
    %23 = math.exp %22 : vector<256x256xf32>
    %cst_18 = arith.constant dense<0.000000e+00> : vector<256xf32>
    %24 = vector.multi_reduction <add>, %23, %cst_18 [1] : vector<256x256xf32> to vector<256xf32>
    %25 = vector.shape_cast %24 : vector<256xf32> to vector<256x1xf32>
    %26 = tpu.reciprocal %25 {approx = true} : vector<256x1xf32> -> vector<256x1xf32>
    %27 = vector.broadcast %26 : vector<256x1xf32> to vector<256x256xf32>
    %28 = arith.mulf %23, %27 : vector<256x256xf32>
    %cst_19 = arith.constant dense<0.000000e+00> : vector<16x256xf32>
    %29 = tpu.matmul %17, %28, %cst_19 {dimension_numbers = #tpu.dot_dimension_numbers<[1], [1], [0], [0], [0, 0, 1, 0], [], []>} : vector<16x256xf32>, vector<256x256xf32>, vector<16x256xf32> -> vector<16x256xf32>
    %c0_20 = arith.constant 0 : index
    %c0_21 = arith.constant 0 : index
    %30 = memref.load %arg8[%c0_20, %c0_21] : memref<1x1xf32, #tpu.memory_space<smem>>
    %31 = vector.broadcast %30 : f32 to vector<16x256xf32>
    %32 = arith.mulf %31, %29 : vector<16x256xf32>
    %33 = arith.addf %32, %1 : vector<16x256xf32>
    %c0_22 = arith.constant 0 : index
    %c0_23 = arith.constant 0 : index
    %c0_24 = arith.constant 0 : index
    %34 = vector.load %arg9[%c0_22, %c0_23, %c0_24] : memref<1x16x256xf32, #tpu.memory_space<vmem>>, vector<1x16x256xf32>
    %35 = vector.shape_cast %34 : vector<1x16x256xf32> to vector<16x256xf32>
    %36 = vector.shape_cast %33 : vector<16x256xf32> to vector<1x16x256xf32>
    tpu.vector_store %arg9[%c0_22, %c0_23, %c0_24], %36 {strides = array<i32>} : memref<1x16x256xf32, #tpu.memory_space<vmem>>, vector<1x16x256xf32>,
    %c0_25 = arith.constant 0 : index
    %c0_26 = arith.constant 0 : index
    %c0_27 = arith.constant 0 : index
    %37 = vector.load %arg10[%c0_25, %c0_26, %c0_27] : memref<1x256x256xf32, #tpu.memory_space<vmem>>, vector<1x256x256xf32>
    %38 = vector.shape_cast %37 : vector<1x256x256xf32> to vector<256x256xf32>
    %39 = vector.shape_cast %28 : vector<256x256xf32> to vector<1x256x256xf32>
    tpu.vector_store %arg10[%c0_25, %c0_26, %c0_27], %39 {strides = array<i32>} : memref<1x256x256xf32, #tpu.memory_space<vmem>>, vector<1x256x256xf32>,
    return
  }
  func.func @transform_0(%arg0: i32) -> (i32, i32, i32) {
    %c0_i32 = arith.constant 0 : i32
    %c0_i32_0 = arith.constant 0 : i32
    %c0_i32_1 = arith.constant 0 : i32
    return %arg0, %c0_i32, %c0_i32_0 : i32, i32, i32
  }
  func.func @transform_1(%arg0: i32) -> (i32, i32) {
    %c0_i32 = arith.constant 0 : i32
    %c0_i32_0 = arith.constant 0 : i32
    %c0_i32_1 = arith.constant 0 : i32
    return %c0_i32, %c0_i32_0 : i32, i32
  }
  func.func @transform_2(%arg0: i32) -> (i32, i32) {
    %c0_i32 = arith.constant 0 : i32
    %c0_i32_0 = arith.constant 0 : i32
    %c0_i32_1 = arith.constant 0 : i32
    return %c0_i32, %c0_i32_0 : i32, i32
  }
  func.func @transform_3(%arg0: i32) -> (i32, i32) {
    %c0_i32 = arith.constant 0 : i32
    %c0_i32_0 = arith.constant 0 : i32
    %c0_i32_1 = arith.constant 0 : i32
    return %c0_i32, %c0_i32_0 : i32, i32
  }
  func.func @transform_4(%arg0: i32) -> (i32, i32) {
    %c0_i32 = arith.constant 0 : i32
    %c0_i32_0 = arith.constant 0 : i32
    %c0_i32_1 = arith.constant 0 : i32
    return %c0_i32, %c0_i32_0 : i32, i32
  }
  func.func @transform_5(%arg0: i32) -> (i32, i32) {
    %c0_i32 = arith.constant 0 : i32
    %c0_i32_0 = arith.constant 0 : i32
    %c0_i32_1 = arith.constant 0 : i32
    return %c0_i32, %c0_i32_0 : i32, i32
  }
  func.func @transform_6(%arg0: i32) -> (i32, i32) {
    %c0_i32 = arith.constant 0 : i32
    %c0_i32_0 = arith.constant 0 : i32
    %c0_i32_1 = arith.constant 0 : i32
    return %c0_i32, %c0_i32_0 : i32, i32
  }
  func.func @transform_7(%arg0: i32) -> (i32, i32) {
    %c0_i32 = arith.constant 0 : i32
    %c0_i32_0 = arith.constant 0 : i32
    %c0_i32_1 = arith.constant 0 : i32
    return %c0_i32, %c0_i32_0 : i32, i32
  }
  func.func @transform_8(%arg0: i32) -> (i32, i32, i32) {
    %c0_i32 = arith.constant 0 : i32
    %c0_i32_0 = arith.constant 0 : i32
    %c0_i32_1 = arith.constant 0 : i32
    return %arg0, %c0_i32, %c0_i32_0 : i32, i32, i32
  }
  func.func @transform_9(%arg0: i32) -> (i32, i32, i32) {
    %c0_i32 = arith.constant 0 : i32
    %c0_i32_0 = arith.constant 0 : i32
    %c0_i32_1 = arith.constant 0 : i32
    return %arg0, %c0_i32, %c0_i32_0 : i32, i32, i32
  }
}

</mosaic_0001>

<bundles_post_ra>
// kernel: tpu_custom_call.1
= control target key start
LH: loop header
LB: loop body
LE: loop exit
PB: predicated region body
PF: predicated region fallthrough
CT: control target
= control target key end

     0   :  { %s4338_s0 = inlined_call_operand.hbm [shape: f32[2,16,256], index: 0, kind: input, shape index: {}]   ;;  %s4339_s1 = inlined_call_operand.vmem [shape: f32[16,2], index: 1, kind: input, shape index: {}]   ;;  %s4340_s2 = inlined_call_operand.vmem [shape: f32[1,2], index: 2, kind: input, shape index: {}]   ;;  %s4341_s3 = inlined_call_operand.vmem [shape: f32[16,2], index: 3, kind: input, shape index: {}]   ;;  %s4342_s4 = inlined_call_operand.vmem [shape: f32[1,2], index: 4, kind: input, shape index: {}]   ;;  %s4343_s5 = inlined_call_operand.vmem [shape: f32[16,16], index: 5, kind: input, shape index: {}]   ;;  %s4344_s6 = inlined_call_operand.vmem [shape: f32[16,1], index: 6, kind: input, shape index: {}]   ;;  %s4345_s7 = inlined_call_operand.<no memory space> [shape: f32[1,1], index: 7, kind: input, shape index: {}]   ;;  %s4346_s8 = inlined_call_operand.hbm [shape: f32[2,16,256], index: 8, kind: output, shape index: {0}]   ;;  %s4347_s9 = inlined_call_operand.hbm [shape: f32[2,256,256], index: 9, kind: output, shape index: {1}]  }
   0x1   :  { %15 = sst [smem:[#allocation2]] %s4345_s7 }
   0x2   :  { %16 = vsyncpa [#allocation4], 0 }
   0x3   :  { %18 = vsyncpa [#allocation4 + $0x1], 0 }
   0x4   :  { %19 = vsyncpa [#allocation5], 0 }
   0x5   :  { %21 = vsyncpa [#allocation5 + $0x1], 0 }
   0x6   :  { %22 = vsyncpa [#allocation8], 0 }
   0x7   :  { %24 = vsyncpa [#allocation8 + $0x1], 0  ;;  %s3184_s11 = smov 0   ;;  %s3186_s12 = smov 0  }
   0x8   :  { %s3188_s13 = smov 0   ;;  %s3190_s14 = smov 0  }
   0x9 LB: > { %s3205_s7 = sadd.s32 4294967295, %s3120_s14   ;;  %s2318_s15 = sadd.s32 4294967294, %s3120_s14   ;;  %s3120_s14 = sphi %s3190_s14, %s4447_s14   ;;  %s3116_s13 = sphi %s3188_s13, %s4446_s13   ;;  %s3112_s12 = sphi %s3186_s12, %s4445_s12   ;;  %s3108_s11 = sphi %s3184_s11, %s4444_s11  }
   0xa   : > { %s3209_s16 = sadd.s32 1, %s3120_s14   ;;  %s37_s17 = sadd.s32 1, %s3116_s13 }
   0xb   : > { %s34_s18 = ssub.s32 %s3120_s14, %s3209_s16  ;;  %p44_p0 = scmp.ne.s32.totalorder %s3116_s13, %s3112_s12 }
   0xc   : > { %p35_p1 = scmp.eq.s32.totalorder %s34_s18, 0  ;;  %p45_p2 = scmp.eq.s32.totalorder %s3120_s14, 0 }
   0xd   : > { %p50_p3 = scmp.ne.s32.totalorder %s3112_s12, %s3108_s11  ;;  %p51_p4 = scmp.eq.s32.totalorder %s3205_s7, 0 }
   0xe   : > { %s3221_s19 = scalar_select %p35_p1, %s3116_s13, %s37_s17  }
   0xf   : > { %p3223_p5 = por %p45_p2, %p44_p0  ;;  %p3227_p6 = por %p51_p4, %p50_p3 }
  0x10   : > { %4378 = sst [smem:[#allocation12_spill]] %s3221_s19  ;;  %p221_p7 = scmp.eq.s32.totalorder %s3205_s7, 1 }
  0x11   : > { %s4380_s21 = scalar_select %p3227_p6, 1, 0 }
  0x12   : > { %p227_p8 = scmp.eq.s32.totalorder %s2318_s15, 1  ;;  %p2760_p10 = scmp.lt.s32.totalorder %s3120_s14, 2 }
  0x13   : > { %p3234_p11 = por %p221_p7, %p44_p0  ;;  %s294_s24 = sand.u32 1, %s3116_s13  }
  0x14   : > { %p3238_p12 = por %p227_p8, %p50_p3  ;;  %s2468_s25 = sshll.u32 %s3120_s14, 9 }
  0x15   : > { %s4381_s22 = scalar_select %p3234_p11, 1, 0 }
  0x16   : > { %s4382_s23 = scalar_select %p3238_p12, 1, 0 }
  0x17   : > { %s2321_s26 = sshll.u32 %s294_s24, 5  ;;  %s3247_s29 = scalar_lea.hbm %s4338_s0, %s2468_s25 }
  0x18   : > { %s298_s30 = scalar_lea.vmem [#allocation3], %s2321_s26  ;;  %p3251_p13 = pnand %p2760_p10, %p3223_p5 }
  0x19   : > { %s305_s10 = sshll.u32 %s298_s30, 4  ;;  %s3257_s17 = scalar_lea.sflag [#allocation4], %s294_s24  ;;  %s3255_s10 = int_to_ptr.vmem [resolvable:$true] %s305_s10 }
  0x1a   : > { %s2998_s18 = scalar_lea.hbm %s3247_s29, 512  ;;  %p3000_p1 = pneg %p3251_p13 }
  0x1b   : > { %p2999_p0 = scmp.ne.s32.totalorder %s3247_s29, %s2998_s18  ;;  %s3003_s26 = scalar_lea.hbm %s4338_s0, 1024 }
  0x1c   : > { %p3004_p4 = scmp.lt.s32.totalorder %s3247_s29, %s4338_s0  ;;  %p3005_p5 = scmp.lt.s32.totalorder %s3003_s26, %s2998_s18 }
  0x1d   : > { %p3001_p2 = pnand %p3000_p1, %p2999_p0 }
  0x1e   : > { %p3006_p7 = por %p3005_p5, %p3004_p4 }
  0x1f   : > { %p3002_p3 = pneg %p3001_p2 }
  0x21   : > { %p3007_p8 = pnand %p3006_p7, %p3002_p3 }
  0x23   : > { %3010 = shalt.err (!%p3007_p8)
}
  0x24   : > { %s3011_s24 = scalar_lea.vmem %s3255_s10, 512  ;;  %s3122_s30 = smov [#allocation3]  }
  0x25   : > { %p3012_p10 = scmp.ne.s32.totalorder %s3255_s10, %s3011_s24  ;;  %s3016_s19 = sshll.u32 %s3122_s30, 4  ;;  %s3017_s19 = int_to_ptr.vmem [resolvable:$false] %s3016_s19 }
  0x26   : > { %s3018_s25 = scalar_lea.vmem %s3017_s19, 1024  ;;  %p3019_p2 = scmp.lt.s32.totalorder %s3255_s10, %s3017_s19 }
  0x27   : > { %p3014_p9 = pnand %p3012_p10, %p3000_p1  ;;  %p3020_p12 = scmp.lt.s32.totalorder %s3018_s25, %s3011_s24 }
  0x29   : > { %p3015_p0 = pneg %p3014_p9  ;;  %p3021_p11 = por %p3020_p12, %p3019_p2 }
  0x2b   : > { %p3022_p6 = pnand %p3021_p11, %p3015_p0 }
  0x2d   : > { %3025 = shalt.err (!%p3022_p6)
}
  0x2e   : > { %s3123_s18 = smov 256   ;;  %s3124_s27 = smov 16  }
  0x2f   : > { %2752 = dma.hbm_to_vmem [thread:$0]  (!%p3251_p13), %s3247_s29, 512, %s3255_s10, %s3257_s17, %s3123_s18, %s3123_s18, %s3124_s27  }
  0x30   : > { %p2324_p9 = scmp.ge.s32.totalorder %s3120_s14, 1  ;;  %p313_p1 = scmp.lt.s32.totalorder %s3120_s14, 3 }
  0x32   : > { %p314_p3 = pnand %p2324_p9, %p313_p1 }
  0x34   : > { %317 = sbr.rel (%p314_p3) target bundleno = 1486 (0x5ce), region = 52 }
  0x39   : > { %s3281_s19 = sand.u32 1, %s3112_s12   ;;  %p4384_p6 = scmp.ne.s32.totalorder %s4380_s21, 0 }
  0x3a   : > { %s4377_s26 = sshll.u32 %s3281_s19, 5  ;;  %s320_s20 = scalar_lea.sflag [#allocation4], %s3281_s19 }
  0x3b   : > { %s3287_s28 = scalar_lea.vmem [#allocation3], %s4377_s26 }
  0x3c   : > { %3095 = dma.done.wait (%p4384_p6), %s320_s20, 512  }
  0x3d   : > { %3097 = vsyncadd (%p4384_p6), %s320_s20, 4294966784  ;;  %v364_v0 = vld [vmem:[%s3287_s28 + $0x8] sm:$0xff]  ;;  %v363_v1 = vld [vmem:[%s3287_s28] sm:$0xff]  ;;  %vm440_vm0 = vcmask 130048   ;;  %vm1093_vm1 = vcmask 15360   ;;  %s2327_s27 = sshll.u32 %s3281_s19, 9 }
  0x3e   : > { %399 = vxpose.xlu0.b32.start [1/2] (short) %v364_v0, 128  ;;  %367 = vxpose.xlu1.b32.start [1/2] (short) %v363_v1, 128  ;;  %v366_v2 = vld [vmem:[%s3287_s28 + $0x18] sm:$0xff]  ;;  %v365_v3 = vld [vmem:[%s3287_s28 + $0x10] sm:$0xff]  ;;  %v432_v4 = vld [vmem:[%s4339_s1 + $0x8] sm:$0xff]  ;;  %s4099_s20 = scalar_lea.vmem [#allocation7], %s2327_s27  ;;  %s2470_s29 = sshll.u32 %s3205_s7, 13 }
  0x3f   : > { %v431_v5 = vld [vmem:[%s4339_s1] sm:$0xff]  ;;  %2635 = vmatprep.subr.mxu0 %v432_v4  ;;  %2739 = vmatprep.subr.mxu1 %v432_v4  ;;  %v763_v6 = vld [vmem:[%s4341_s3 + $0x8] sm:$0xff]  ;;  %s2213_s10 = sshll.u32 %s4099_s20, 4  ;;  %s4252_s21 = scalar_lea.hbm %s4347_s9, %s2470_s29  ;;  %s4254_s10 = int_to_ptr.vmem [resolvable:$true] %s2213_s10 }
  0x40   : > { %2636 = vmatpush3.msra.mxu0 %v432_v4  ;;  %2741 = vmatpush3.msra.mxu1 %v432_v4  ;;  %v762_v39 = vld [vmem:[%s4341_s3] sm:$0xff]  ;;  %s2184_s24 = scalar_lea.sflag [#allocation8], %s3281_s19  ;;  %s3026_s30 = scalar_lea.vmem %s4254_s10, 8192 }
  0x41   : > { %2637 = vmatprep.subr.mxu0 %v431_v5  ;;  %2740 = vmatprep.subr.mxu1 %v431_v5  ;;  %v3422_v41 = vld [vmem:[%s4340_s2] ss:$0 sm:$0xff]  ;;  %p3027_p11 = scmp.ne.s32.totalorder %s4254_s10, %s3026_s30  ;;  %p4439_p12 = scmp.ne.s32.totalorder %s4381_s22, 0 }
  0x42   : > { %400 = vxpose.xlu0.b32.end [2/2] (short) %v366_v2, 128  ;;  %368 = vxpose.xlu1.b32.end [2/2] (short) %v365_v3, 128  ;;  %s3127_s25 = smov [#allocation7]  }
  0x43   : > { %2638 = vmatpush3.msra.mxu0 %v431_v5  ;;  %2742 = vmatpush3.msra.mxu1 %v431_v5  ;;  %p3028_p13 = pnand %p3027_p11, %p4439_p12  ;;  %s3030_s18 = sshll.u32 %s3127_s25, 4  ;;  %s3031_s18 = int_to_ptr.vmem [resolvable:$false] %s3030_s18 }
  0x44   : > { %1044 = vmatprep.subr.mxu0 %v366_v2  ;;  %2687 = vmatprep.subr.mxu1 %v763_v6  ;;  %s3032_s27 = scalar_lea.vmem %s3031_s18, 16384  ;;  %p3033_p5 = scmp.lt.s32.totalorder %s4254_s10, %s3031_s18 }
  0x45   : > { %p3029_p4 = pneg %p3028_p13  ;;  %p3034_p7 = scmp.lt.s32.totalorder %s3032_s27, %s3026_s30 }
  0x47   : > { %p3035_p8 = por %p3034_p7, %p3033_p5 }
  0x49   : > { %p3036_p10 = pnand %p3035_p8, %p3029_p4 }
  0xba   : > { %v3306_v7 = vpop.trf.xlu0  ;;  %v383_v8 = vpop.trf.xlu1 }
  0xbb   : > { %2639 = vmatprep.mubr.msk.f32.mxu0 %vm440_vm0, %v383_v8 }
  0xbe   : > { %v3309_v9 = vpop.trf.xlu0  ;;  %v384_v10 = vpop.trf.xlu1 }
  0xbf   : > { %2640 = vmatmul.mubr.msk.f32.vlgmr.msra.gmra.mxu0 %vm440_vm0, %v384_v10 }
  0xc0   : > { %1045 = vmatpush1.msra.mxu0 %v365_v3 }
  0xc1   : > { %1046 = vmatprep.subr.mxu0 %v364_v0 }
  0xc2   : > { %v3312_v11 = vpop.trf.xlu0  ;;  %v385_v12 = vpop.trf.xlu1  ;;  %1047 = vmatpush1.msra.mxu0 %v363_v1 }
  0xc3   : > { %2642 = vmatprep.mubr.msk.f32.mxu0 %vm440_vm0, %v385_v12 }
  0xc6   : > { %v3315_v13 = vpop.trf.xlu0  ;;  %v386_v14 = vpop.trf.xlu1 }
  0xc7   : > { %2643 = vmatmul.mubr.msk.f32.gmra.mxu0 %vm440_vm0, %v386_v14 }
  0xca   : > { %v3318_v15 = vpop.trf.xlu0  ;;  %v387_v16 = vpop.trf.xlu1 }
  0xcb   : > { %2645 = vmatprep.mubr.msk.f32.mxu0 %vm440_vm0, %v387_v16 }
  0xce   : > { %v3321_v17 = vpop.trf.xlu0  ;;  %v388_v18 = vpop.trf.xlu1 }
  0xcf   : > { %2646 = vmatmul.mubr.msk.f32.gmra.mxu0 %vm440_vm0, %v388_v18 }
  0xd2   : > { %v3324_v19 = vpop.trf.xlu0  ;;  %v389_v20 = vpop.trf.xlu1 }
  0xd3   : > { %2648 = vmatprep.mubr.msk.f32.mxu0 %vm440_vm0, %v389_v20 }
  0xd6   : > { %v3327_v21 = vpop.trf.xlu0  ;;  %v390_v22 = vpop.trf.xlu1 }
  0xd7   : > { %2649 = vmatmul.mubr.msk.f32.gmra.mxu0 %vm440_vm0, %v390_v22 }
  0xda   : > { %v3330_v23 = vpop.trf.xlu0  ;;  %v391_v24 = vpop.trf.xlu1 }
  0xdb   : > { %2651 = vmatprep.mubr.msk.f32.mxu0 %vm440_vm0, %v391_v24 }
  0xde   : > { %v3333_v25 = vpop.trf.xlu0  ;;  %v392_v26 = vpop.trf.xlu1 }
  0xdf   : > { %2652 = vmatmul.mubr.msk.f32.gmra.mxu0 %vm440_vm0, %v392_v26 }
  0xe2   : > { %v3336_v27 = vpop.trf.xlu0  ;;  %v393_v28 = vpop.trf.xlu1 }
  0xe3   : > { %2654 = vmatprep.mubr.msk.f32.mxu0 %vm440_vm0, %v393_v28 }
  0xe6   : > { %v426_v29 = vpop.trf.xlu0  ;;  %v394_v30 = vpop.trf.xlu1 }
  0xe7   : > { %2655 = vmatmul.mubr.msk.f32.gmra.mxu0 %vm440_vm0, %v394_v30 }
  0xea   : > { %v427_v31 = vpop.trf.xlu0  ;;  %v395_v32 = vpop.trf.xlu1 }
  0xeb   : > { %2657 = vmatprep.mubr.msk.f32.mxu0 %vm440_vm0, %v395_v32 }
  0xee   : > { %v428_v33 = vpop.trf.xlu0  ;;  %v396_v34 = vpop.trf.xlu1 }
  0xef   : > { %2658 = vmatmul.mubr.msk.f32.gmra.mxu0 %vm440_vm0, %v396_v34 }
  0xf2   : > { %v429_v35 = vpop.trf.xlu0  ;;  %v397_v36 = vpop.trf.xlu1 }
  0xf3   : > { %2684 = vmatprep.mubr.msk.f32.mxu1 %vm440_vm0, %v429_v35  ;;  %2660 = vmatprep.mubr.msk.f32.mxu0 %vm440_vm0, %v397_v36 }
  0xf6   : > { %v430_v37 = vpop.trf.xlu0  ;;  %v398_v38 = vpop.trf.xlu1 }
  0xf7   : > { %2661 = vmatmul.mubr.msk.f32.gmra.mxu0 %vm440_vm0, %v398_v38  ;;  %2685 = vmatmul.mubr.msk.f32.vlgmr.msra.gmra.mxu1 %vm440_vm0, %v430_v37 }
  0xf8   : > { %2663 = vmatprep.mubr.msk.f32.mxu0 %vm440_vm0, %v3306_v7  ;;  %2688 = vmatpush3.msra.mxu1 %v763_v6 }
  0xf9   : > { %2691 = vmatprep.mubr.msk.f32.mxu1 %vm440_vm0, %v383_v8  ;;  %2689 = vmatprep.subr.mxu1 %v762_v39 }
  0xfa   : > { %2690 = vmatpush3.msra.mxu1 %v762_v39 }
  0xfb   : > { %2664 = vmatmul.mubr.msk.f32.gmra.mxu0 %vm440_vm0, %v3309_v9  ;;  %2692 = vmatmul.mubr.msk.f32.vlgmr.msra.gmra.mxu1 %vm440_vm0, %v384_v10 }
  0xfc   : > { %2666 = vmatprep.mubr.msk.f32.mxu0 %vm440_vm0, %v3312_v11  ;;  %2694 = vmatprep.mubr.msk.f32.mxu1 %vm440_vm0, %v385_v12  ;;  %v3456_v12 = vld [vmem:[%s4342_s4] ss:$0 sm:$0xff] }
  0xff   : > { %2667 = vmatmul.mubr.msk.f32.gmra.mxu0 %vm440_vm0, %v3315_v13  ;;  %2695 = vmatmul.mubr.msk.f32.gmra.mxu1 %vm440_vm0, %v386_v14 }
 0x100   : > { %2669 = vmatprep.mubr.msk.f32.mxu0 %vm440_vm0, %v3318_v15  ;;  %2697 = vmatprep.mubr.msk.f32.mxu1 %vm440_vm0, %v387_v16 }
 0x103   : > { %2670 = vmatmul.mubr.msk.f32.gmra.mxu0 %vm440_vm0, %v3321_v17  ;;  %2698 = vmatmul.mubr.msk.f32.gmra.mxu1 %vm440_vm0, %v388_v18 }
 0x104   : > { %2672 = vmatprep.mubr.msk.f32.mxu0 %vm440_vm0, %v3324_v19  ;;  %2700 = vmatprep.mubr.msk.f32.mxu1 %vm440_vm0, %v389_v20 }
 0x107   : > { %2673 = vmatmul.mubr.msk.f32.gmra.mxu0 %vm440_vm0, %v3327_v21  ;;  %2701 = vmatmul.mubr.msk.f32.gmra.mxu1 %vm440_vm0, %v390_v22 }
 0x108   : > { %2675 = vmatprep.mubr.msk.f32.mxu0 %vm440_vm0, %v3330_v23  ;;  %2703 = vmatprep.mubr.msk.f32.mxu1 %vm440_vm0, %v391_v24 }
 0x10b   : > { %2676 = vmatmul.mubr.msk.f32.gmra.mxu0 %vm440_vm0, %v3333_v25  ;;  %2704 = vmatmul.mubr.msk.f32.gmra.mxu1 %vm440_vm0, %v392_v26 }
 0x10c   : > { %2678 = vmatprep.mubr.msk.f32.mxu0 %vm440_vm0, %v3336_v27  ;;  %2706 = vmatprep.mubr.msk.f32.mxu1 %vm440_vm0, %v393_v28 }
 0x10f   : > { %2679 = vmatmul.mubr.msk.f32.gmra.mxu0 %vm440_vm0, %v426_v29  ;;  %2707 = vmatmul.mubr.msk.f32.gmra.mxu1 %vm440_vm0, %v394_v30 }
 0x110   : > { %2681 = vmatprep.mubr.msk.f32.mxu0 %vm440_vm0, %v427_v31  ;;  %2709 = vmatprep.mubr.msk.f32.mxu1 %vm440_vm0, %v395_v32 }
 0x113   : > { %2682 = vmatmul.mubr.msk.f32.gmra.mxu0 %vm440_vm0, %v428_v33  ;;  %2710 = vmatmul.mubr.msk.f32.gmra.mxu1 %vm440_vm0, %v396_v34 }
 0x114   : > { %2712 = vmatprep.mubr.msk.f32.mxu1 %vm440_vm0, %v397_v36 }
 0x117   : > { %2713 = vmatmul.mubr.msk.f32.gmra.mxu1 %vm440_vm0, %v398_v38 }
 0x118   : > { %2715 = vmatprep.mubr.msk.f32.mxu1 %vm440_vm0, %v3306_v7 }
 0x11b   : > { %2716 = vmatmul.mubr.msk.f32.gmra.mxu1 %vm440_vm0, %v3309_v9 }
 0x11c   : > { %2718 = vmatprep.mubr.msk.f32.mxu1 %vm440_vm0, %v3312_v11 }
 0x11f   : > { %2719 = vmatmul.mubr.msk.f32.gmra.mxu1 %vm440_vm0, %v3315_v13 }
 0x120   : > { %2721 = vmatprep.mubr.msk.f32.mxu1 %vm440_vm0, %v3318_v15 }
 0x123   : > { %2722 = vmatmul.mubr.msk.f32.gmra.mxu1 %vm440_vm0, %v3321_v17 }
 0x124   : > { %2724 = vmatprep.mubr.msk.f32.mxu1 %vm440_vm0, %v3324_v19 }
 0x127   : > { %2725 = vmatmul.mubr.msk.f32.gmra.mxu1 %vm440_vm0, %v3327_v21 }
 0x128   : > { %2727 = vmatprep.mubr.msk.f32.mxu1 %vm440_vm0, %v3330_v23 }
 0x12b   : > { %2728 = vmatmul.mubr.msk.f32.gmra.mxu1 %vm440_vm0, %v3333_v25 }
 0x12c   : > { %2730 = vmatprep.mubr.msk.f32.mxu1 %vm440_vm0, %v3336_v27 }
 0x12f   : > { %2731 = vmatmul.mubr.msk.f32.gmra.mxu1 %vm440_vm0, %v426_v29 }
 0x130   : > { %2733 = vmatprep.mubr.msk.f32.mxu1 %vm440_vm0, %v427_v31 }
 0x133   : > { %2734 = vmatmul.mubr.msk.f32.gmra.mxu1 %vm440_vm0, %v428_v33 }
 0x134   : > { %2736 = vmatprep.mubr.msk.f32.mxu1 %vm440_vm0, %v429_v35 }
 0x137   : > { %2737 = vmatmul.mubr.msk.f32.gmra.mxu1 %vm440_vm0, %v430_v37 }
 0x17f   : > { %v3417_v40 = vpop.f32.mrf.mxu0 }
 0x181   : > { %v603_v42 = vpop.f32.mrf.mxu0 }
 0x182   : > { %v3425_v43 = vadd.f32 %v3422_v41, %v603_v42 }
 0x184   : > { %2571 = vmatprep.mubr.msk.f32.mxu1 %vm1093_vm1, %v3425_v43 }
 0x1b7   : > { %v3429_v44 = vpop.f32.mrf.mxu1 }
 0x1b9   : > { %v3431_v45 = vpop.f32.mrf.mxu1 }
 0x1bb   : > { %v3433_v46 = vpop.f32.mrf.mxu1 }
 0x1bd   : > { %v3435_v47 = vpop.f32.mrf.mxu1 }
 0x1bf   : > { %v3437_v48 = vpop.f32.mrf.mxu1 }
 0x1c0   : > { %v853_v42 = vadd.f32 %v3437_v48, %v3456_v12  ;;  %v843_v48 = vadd.f32 %v3433_v46, %v3456_v12 }
 0x1c1   : > { %v3439_v49 = vpop.f32.mrf.mxu1 }
 0x1c3   : > { %v3441_v50 = vpop.f32.mrf.mxu1 }
 0x1c4   : > { %v863_v36 = vadd.f32 %v3441_v50, %v3456_v12 }
 0x1c5   : > { %v3443_v51 = vpop.f32.mrf.mxu1 }
 0x1c6   : > { %v858_v38 = vadd.f32 %v3456_v12, %v3443_v51 }
 0x1c7   : > { %v2702_v52 = vpop.f32.mrf.mxu1 }
 0x1c8   : > { %v873_v32 = vadd.f32 %v2702_v52, %v3456_v12  ;;  %v848_v52 = vadd.f32 %v3456_v12, %v3439_v49  ;;  %v838_v49 = vadd.f32 %v3456_v12, %v3435_v47 }
 0x1c9   : > { %v3445_v53 = vpop.f32.mrf.mxu1 }
 0x1ca   : > { %v868_v34 = vadd.f32 %v3456_v12, %v3445_v53 }
 0x1cb   : > { %v2705_v54 = vpop.f32.mrf.mxu1 }
 0x1cc   : > { %v883_v28 = vadd.f32 %v2705_v54, %v3456_v12  ;;  %v2644_v54 = vpop.f32.mrf.mxu0 }
 0x1cd   : > { %v877_v55 = vpop.f32.mrf.mxu1  ;;  %v619_v47 = vadd.f32 %v2644_v54, %v3422_v41 }
 0x1ce   : > { %v878_v30 = vadd.f32 %v3456_v12, %v877_v55  ;;  %v609_v55 = vadd.f32 %v3417_v40, %v3422_v41 }
 0x1cf   : > { %v2708_v56 = vpop.f32.mrf.mxu1 }
 0x1d0   : > { %v893_v24 = vadd.f32 %v2708_v56, %v3456_v12  ;;  %v613_v56 = vpop.f32.mrf.mxu0 }
 0x1d1   : > { %v887_v57 = vpop.f32.mrf.mxu1  ;;  %v614_v46 = vadd.f32 %v3422_v41, %v613_v56 }
 0x1d2   : > { %v888_v26 = vadd.f32 %v3456_v12, %v887_v57  ;;  %v2647_v57 = vpop.f32.mrf.mxu0 }
 0x1d3   : > { %v2711_v58 = vpop.f32.mrf.mxu1 }
 0x1d4   : > { %v903_v20 = vadd.f32 %v2711_v58, %v3456_v12  ;;  %v623_v58 = vpop.f32.mrf.mxu0 }
 0x1d5   : > { %v897_v59 = vpop.f32.mrf.mxu1  ;;  %v624_v40 = vadd.f32 %v3422_v41, %v623_v58 }
 0x1d6   : > { %v898_v22 = vadd.f32 %v3456_v12, %v897_v59  ;;  %v2650_v59 = vpop.f32.mrf.mxu0 }
 0x1d7   : > { %v2714_v60 = vpop.f32.mrf.mxu1 }
 0x1d8   : > { %v913_v15 = vadd.f32 %v2714_v60, %v3456_v12  ;;  %v633_v60 = vpop.f32.mrf.mxu0 }
 0x1d9   : > { %v907_v61 = vpop.f32.mrf.mxu1 }
 0x1da   : > { %v908_v18 = vadd.f32 %v3456_v12, %v907_v61  ;;  %v634_v61 = vadd.f32 %v3422_v41, %v633_v60 }
 0x1db   : > { %v3447_v62 = vpop.f32.mrf.mxu1 }
 0x1dc   : > { %v923_v51 = vadd.f32 %v3447_v62, %v3456_v12  ;;  %v2653_v62 = vpop.f32.mrf.mxu0 }
 0x1dd   : > { %v3449_v63 = vpop.f32.mrf.mxu1 }
 0x1de   : > { %v918_v53 = vadd.f32 %v3456_v12, %v3449_v63  ;;  %v639_v63 = vadd.f32 %v2650_v59, %v3422_v41 }
 0x1df   : > { %v2720_v0 = vpop.f32.mrf.mxu1 }
 0x1e0   : > { %v933_v39 = vadd.f32 %v2720_v0, %v3456_v12  ;;  %v643_v0 = vpop.f32.mrf.mxu0 }
 0x1e1   : > { %v3451_v1 = vpop.f32.mrf.mxu1 }
 0x1e2   : > { %v928_v50 = vadd.f32 %v3456_v12, %v3451_v1  ;;  %v644_v1 = vadd.f32 %v3422_v41, %v643_v0 }
 0x1e3   : > { %v2723_v2 = vpop.f32.mrf.mxu1 }
 0x1e4   : > { %v943_v35 = vadd.f32 %v2723_v2, %v3456_v12  ;;  %v2656_v2 = vpop.f32.mrf.mxu0 }
 0x1e5   : > { %v937_v3 = vpop.f32.mrf.mxu1 }
 0x1e6   : > { %v938_v37 = vadd.f32 %v3456_v12, %v937_v3  ;;  %v649_v3 = vadd.f32 %v2653_v62, %v3422_v41 }
 0x1e7   : > { %v2726_v4 = vpop.f32.mrf.mxu1 }
 0x1e8   : > { %v953_v31 = vadd.f32 %v2726_v4, %v3456_v12  ;;  %v653_v4 = vpop.f32.mrf.mxu0 }
 0x1e9   : > { %v947_v5 = vpop.f32.mrf.mxu1 }
 0x1ea   : > { %v948_v33 = vadd.f32 %v3456_v12, %v947_v5  ;;  %v654_v5 = vadd.f32 %v3422_v41, %v653_v4 }
 0x1eb   : > { %v2729_v6 = vpop.f32.mrf.mxu1 }
 0x1ec   : > { %v963_v27 = vadd.f32 %v2729_v6, %v3456_v12  ;;  %v2659_v6 = vpop.f32.mrf.mxu0 }
 0x1ed   : > { %v957_v7 = vpop.f32.mrf.mxu1 }
 0x1ee   : > { %v958_v29 = vadd.f32 %v3456_v12, %v957_v7  ;;  %v659_v7 = vadd.f32 %v2656_v2, %v3422_v41 }
 0x1ef   : > { %v2732_v8 = vpop.f32.mrf.mxu1 }
 0x1f0   : > { %v973_v23 = vadd.f32 %v2732_v8, %v3456_v12  ;;  %v663_v8 = vpop.f32.mrf.mxu0 }
 0x1f1   : > { %v967_v9 = vpop.f32.mrf.mxu1 }
 0x1f2   : > { %v968_v25 = vadd.f32 %v3456_v12, %v967_v9  ;;  %v664_v9 = vadd.f32 %v3422_v41, %v663_v8 }
 0x1f3   : > { %v2735_v10 = vpop.f32.mrf.mxu1 }
 0x1f4   : > { %v983_v19 = vadd.f32 %v2735_v10, %v3456_v12  ;;  %v2662_v10 = vpop.f32.mrf.mxu0 }
 0x1f5   : > { %v977_v11 = vpop.f32.mrf.mxu1 }
 0x1f6   : > { %v978_v21 = vadd.f32 %v3456_v12, %v977_v11  ;;  %v669_v11 = vadd.f32 %v2659_v6, %v3422_v41 }
 0x1f7   : > { %v2738_v13 = vpop.f32.mrf.mxu1 }
 0x1f8   : > { %v993_v14 = vadd.f32 %v2738_v13, %v3456_v12 }
 0x1f9   : > { %v987_v16 = vpop.f32.mrf.mxu1 }
 0x1fa   : > { %v988_v17 = vadd.f32 %v3456_v12, %v987_v16  ;;  %2539 = vmatprep.subr.msk.mxu1 %vm1093_vm1, %v993_v14  ;;  %v673_v12 = vpop.f32.mrf.mxu0 }
 0x1fb   : > { %2540 = vmatpush3.xpose.msk.msra.mxu1 %vm1093_vm1, %v913_v15  ;;  %v674_v13 = vadd.f32 %v3422_v41, %v673_v12  ;;  %v679_v15 = vadd.f32 %v2662_v10, %v3422_v41 }
 0x1fc   : > { %2541 = vmatprep.subr.msk.mxu1 %vm1093_vm1, %v988_v17  ;;  %v2665_v14 = vpop.f32.mrf.mxu0 }
 0x1fe   : > { %v683_v16 = vpop.f32.mrf.mxu0 }
 0x1ff   : > { %2542 = vmatpush3.xpose.msk.msra.mxu1 %vm1093_vm1, %v908_v18  ;;  %v684_v17 = vadd.f32 %v3422_v41, %v683_v16 }
 0x200   : > { %2543 = vmatprep.subr.msk.mxu1 %vm1093_vm1, %v983_v19  ;;  %v2668_v18 = vpop.f32.mrf.mxu0  ;;  %v689_v19 = vadd.f32 %v2665_v14, %v3422_v41 }
 0x203   : > { %2544 = vmatpush3.xpose.msk.msra.mxu1 %vm1093_vm1, %v903_v20  ;;  %v693_v20 = vpop.f32.mrf.mxu0 }
 0x204   : > { %2545 = vmatprep.subr.msk.mxu1 %vm1093_vm1, %v978_v21  ;;  %v694_v21 = vadd.f32 %v3422_v41, %v693_v20 }
 0x207   : > { %2546 = vmatpush3.xpose.msk.msra.mxu1 %vm1093_vm1, %v898_v22  ;;  %v2671_v22 = vpop.f32.mrf.mxu0 }
 0x208   : > { %2547 = vmatprep.subr.msk.mxu1 %vm1093_vm1, %v973_v23  ;;  %v699_v23 = vadd.f32 %v2668_v18, %v3422_v41 }
 0x20b   : > { %2548 = vmatpush3.xpose.msk.msra.mxu1 %vm1093_vm1, %v893_v24  ;;  %v703_v24 = vpop.f32.mrf.mxu0 }
 0x20c   : > { %2549 = vmatprep.subr.msk.mxu1 %vm1093_vm1, %v968_v25  ;;  %v704_v25 = vadd.f32 %v3422_v41, %v703_v24 }
 0x20f   : > { %2550 = vmatpush3.xpose.msk.msra.mxu1 %vm1093_vm1, %v888_v26  ;;  %v2674_v26 = vpop.f32.mrf.mxu0 }
 0x210   : > { %2551 = vmatprep.subr.msk.mxu1 %vm1093_vm1, %v963_v27  ;;  %v709_v27 = vadd.f32 %v2671_v22, %v3422_v41 }
 0x213   : > { %2552 = vmatpush3.xpose.msk.msra.mxu1 %vm1093_vm1, %v883_v28  ;;  %v713_v28 = vpop.f32.mrf.mxu0 }
 0x214   : > { %2553 = vmatprep.subr.msk.mxu1 %vm1093_vm1, %v958_v29  ;;  %v714_v29 = vadd.f32 %v3422_v41, %v713_v28 }
 0x217   : > { %2554 = vmatpush3.xpose.msk.msra.mxu1 %vm1093_vm1, %v878_v30  ;;  %v2677_v30 = vpop.f32.mrf.mxu0 }
 0x218   : > { %2555 = vmatprep.subr.msk.mxu1 %vm1093_vm1, %v953_v31  ;;  %v719_v31 = vadd.f32 %v2674_v26, %v3422_v41 }
 0x21b   : > { %2556 = vmatpush3.xpose.msk.msra.mxu1 %vm1093_vm1, %v873_v32  ;;  %v723_v32 = vpop.f32.mrf.mxu0 }
 0x21c   : > { %2557 = vmatprep.subr.msk.mxu1 %vm1093_vm1, %v948_v33  ;;  %v724_v33 = vadd.f32 %v3422_v41, %v723_v32 }
 0x21f   : > { %2558 = vmatpush3.xpose.msk.msra.mxu1 %vm1093_vm1, %v868_v34  ;;  %v2680_v34 = vpop.f32.mrf.mxu0 }
 0x220   : > { %2559 = vmatprep.subr.msk.mxu1 %vm1093_vm1, %v943_v35  ;;  %v729_v35 = vadd.f32 %v2677_v30, %v3422_v41 }
 0x223   : > { %2560 = vmatpush3.xpose.msk.msra.mxu1 %vm1093_vm1, %v863_v36  ;;  %v733_v36 = vpop.f32.mrf.mxu0 }
 0x224   : > { %2561 = vmatprep.subr.msk.mxu1 %vm1093_vm1, %v938_v37  ;;  %v734_v37 = vadd.f32 %v3422_v41, %v733_v36 }
 0x227   : > { %2562 = vmatpush3.xpose.msk.msra.mxu1 %vm1093_vm1, %v858_v38  ;;  %v2683_v38 = vpop.f32.mrf.mxu0 }
 0x228   : > { %2563 = vmatprep.subr.msk.mxu1 %vm1093_vm1, %v933_v39  ;;  %v739_v39 = vadd.f32 %v2680_v34, %v3422_v41 }
 0x22b   : > { %2564 = vmatpush3.xpose.msk.msra.mxu1 %vm1093_vm1, %v853_v42  ;;  %v743_v42 = vpop.f32.mrf.mxu0 }
 0x22c   : > { %2565 = vmatprep.subr.msk.mxu1 %vm1093_vm1, %v928_v50  ;;  %v744_v50 = vadd.f32 %v3422_v41, %v743_v42 }
 0x22f   : > { %2566 = vmatpush3.xpose.msk.msra.mxu1 %vm1093_vm1, %v848_v52  ;;  %v749_v52 = vadd.f32 %v2683_v38, %v3422_v41 }
 0x230   : > { %2567 = vmatprep.subr.msk.mxu1 %vm1093_vm1, %v923_v51  ;;  %v754_v51 = vadd.f32 %v3422_v41, %v3431_v45 }
 0x233   : > { %2568 = vmatpush3.xpose.msk.msra.mxu1 %vm1093_vm1, %v843_v48  ;;  %v759_v48 = vadd.f32 %v3429_v44, %v3422_v41 }
 0x234   : > { %2569 = vmatprep.subr.msk.mxu1 %vm1093_vm1, %v918_v53 }
 0x237   : > { %2570 = vmatpush3.xpose.msk.msra.mxu1 %vm1093_vm1, %v838_v49 }
 0x23a   : > { %2572 = vmatmul.mubr.msk.f32.vlgmr.msra.gmra.mxu1 %vm1093_vm1, %v3425_v43  ;;  %v629_v43 = vadd.f32 %v2647_v57, %v3422_v41 }
 0x23b   : > { %2573 = vmatprep.mubr.msk.f32.mxu1 %vm1093_vm1, %v609_v55 }
 0x23e   : > { %2574 = vmatmul.mubr.msk.f32.gmra.mxu1 %vm1093_vm1, %v609_v55 }
 0x23f   : > { %2575 = vmatprep.mubr.msk.f32.mxu1 %vm1093_vm1, %v614_v46 }
 0x242   : > { %2576 = vmatmul.mubr.msk.f32.gmra.mxu1 %vm1093_vm1, %v614_v46 }
 0x243   : > { %2577 = vmatprep.mubr.msk.f32.mxu1 %vm1093_vm1, %v619_v47 }
 0x246   : > { %2578 = vmatmul.mubr.msk.f32.gmra.mxu1 %vm1093_vm1, %v619_v47 }
 0x247   : > { %2579 = vmatprep.mubr.msk.f32.mxu1 %vm1093_vm1, %v624_v40 }
 0x24a   : > { %2580 = vmatmul.mubr.msk.f32.gmra.mxu1 %vm1093_vm1, %v624_v40 }
 0x24b   : > { %2581 = vmatprep.mubr.msk.f32.mxu1 %vm1093_vm1, %v629_v43 }
 0x24e   : > { %2582 = vmatmul.mubr.msk.f32.gmra.mxu1 %vm1093_vm1, %v629_v43 }
 0x24f   : > { %2583 = vmatprep.mubr.msk.f32.mxu1 %vm1093_vm1, %v634_v61 }
 0x252   : > { %2584 = vmatmul.mubr.msk.f32.gmra.mxu1 %vm1093_vm1, %v634_v61 }
 0x253   : > { %2585 = vmatprep.mubr.msk.f32.mxu1 %vm1093_vm1, %v639_v63 }
 0x256   : > { %2586 = vmatmul.mubr.msk.f32.gmra.mxu1 %vm1093_vm1, %v639_v63 }
 0x257   : > { %2587 = vmatprep.mubr.msk.f32.mxu1 %vm1093_vm1, %v644_v1 }
 0x25a   : > { %2588 = vmatmul.mubr.msk.f32.gmra.mxu1 %vm1093_vm1, %v644_v1 }
 0x25b   : > { %2589 = vmatprep.mubr.msk.f32.mxu1 %vm1093_vm1, %v649_v3 }
 0x25e   : > { %2590 = vmatmul.mubr.msk.f32.gmra.mxu1 %vm1093_vm1, %v649_v3 }
 0x25f   : > { %2591 = vmatprep.mubr.msk.f32.mxu1 %vm1093_vm1, %v654_v5 }
 0x262   : > { %2592 = vmatmul.mubr.msk.f32.gmra.mxu1 %vm1093_vm1, %v654_v5 }
 0x263   : > { %2593 = vmatprep.mubr.msk.f32.mxu1 %vm1093_vm1, %v659_v7 }
 0x266   : > { %2594 = vmatmul.mubr.msk.f32.gmra.mxu1 %vm1093_vm1, %v659_v7 }
 0x267   : > { %2595 = vmatprep.mubr.msk.f32.mxu1 %vm1093_vm1, %v664_v9 }
 0x26a   : > { %2596 = vmatmul.mubr.msk.f32.gmra.mxu1 %vm1093_vm1, %v664_v9 }
 0x26b   : > { %2597 = vmatprep.mubr.msk.f32.mxu1 %vm1093_vm1, %v669_v11 }
 0x26e   : > { %2598 = vmatmul.mubr.msk.f32.gmra.mxu1 %vm1093_vm1, %v669_v11 }
 0x26f   : > { %2599 = vmatprep.mubr.msk.f32.mxu1 %vm1093_vm1, %v674_v13 }
 0x272   : > { %2600 = vmatmul.mubr.msk.f32.gmra.mxu1 %vm1093_vm1, %v674_v13 }
 0x273   : > { %2601 = vmatprep.mubr.msk.f32.mxu1 %vm1093_vm1, %v679_v15 }
 0x276   : > { %2602 = vmatmul.mubr.msk.f32.gmra.mxu1 %vm1093_vm1, %v679_v15 }
 0x277   : > { %2603 = vmatprep.mubr.msk.f32.mxu1 %vm1093_vm1, %v684_v17 }
 0x27a   : > { %2604 = vmatmul.mubr.msk.f32.gmra.mxu1 %vm1093_vm1, %v684_v17 }
 0x27b   : > { %2605 = vmatprep.mubr.msk.f32.mxu1 %vm1093_vm1, %v689_v19 }
 0x27e   : > { %2606 = vmatmul.mubr.msk.f32.gmra.mxu1 %vm1093_vm1, %v689_v19 }
 0x27f   : > { %2607 = vmatprep.mubr.msk.f32.mxu1 %vm1093_vm1, %v694_v21 }
 0x282   : > { %2608 = vmatmul.mubr.msk.f32.gmra.mxu1 %vm1093_vm1, %v694_v21 }
 0x283   : > { %2609 = vmatprep.mubr.msk.f32.mxu1 %vm1093_vm1, %v699_v23 }
 0x286   : > { %2610 = vmatmul.mubr.msk.f32.gmra.mxu1 %vm1093_vm1, %v699_v23 }
 0x287   : > { %2611 = vmatprep.mubr.msk.f32.mxu1 %vm1093_vm1, %v704_v25 }
 0x28a   : > { %2612 = vmatmul.mubr.msk.f32.gmra.mxu1 %vm1093_vm1, %v704_v25 }
 0x28b   : > { %2613 = vmatprep.mubr.msk.f32.mxu1 %vm1093_vm1, %v709_v27 }
 0x28e   : > { %2614 = vmatmul.mubr.msk.f32.gmra.mxu1 %vm1093_vm1, %v709_v27 }
 0x28f   : > { %2615 = vmatprep.mubr.msk.f32.mxu1 %vm1093_vm1, %v714_v29 }
 0x292   : > { %2616 = vmatmul.mubr.msk.f32.gmra.mxu1 %vm1093_vm1, %v714_v29 }
 0x293   : > { %2617 = vmatprep.mubr.msk.f32.mxu1 %vm1093_vm1, %v719_v31 }
 0x296   : > { %2618 = vmatmul.mubr.msk.f32.gmra.mxu1 %vm1093_vm1, %v719_v31 }
 0x297   : > { %2619 = vmatprep.mubr.msk.f32.mxu1 %vm1093_vm1, %v724_v33 }
 0x29a   : > { %2620 = vmatmul.mubr.msk.f32.gmra.mxu1 %vm1093_vm1, %v724_v33 }
 0x29b   : > { %2621 = vmatprep.mubr.msk.f32.mxu1 %vm1093_vm1, %v729_v35 }
 0x29e   : > { %2622 = vmatmul.mubr.msk.f32.gmra.mxu1 %vm1093_vm1, %v729_v35 }
 0x29f   : > { %2623 = vmatprep.mubr.msk.f32.mxu1 %vm1093_vm1, %v734_v37 }
 0x2a2   : > { %2624 = vmatmul.mubr.msk.f32.gmra.mxu1 %vm1093_vm1, %v734_v37 }
 0x2a3   : > { %2625 = vmatprep.mubr.msk.f32.mxu1 %vm1093_vm1, %v739_v39 }
 0x2a6   : > { %2626 = vmatmul.mubr.msk.f32.gmra.mxu1 %vm1093_vm1, %v739_v39 }
 0x2a7   : > { %2627 = vmatprep.mubr.msk.f32.mxu1 %vm1093_vm1, %v744_v50 }
 0x2aa   : > { %2628 = vmatmul.mubr.msk.f32.gmra.mxu1 %vm1093_vm1, %v744_v50 }
 0x2ab   : > { %2629 = vmatprep.mubr.msk.f32.mxu1 %vm1093_vm1, %v749_v52 }
 0x2ae   : > { %2630 = vmatmul.mubr.msk.f32.gmra.mxu1 %vm1093_vm1, %v749_v52 }
 0x2af   : > { %2631 = vmatprep.mubr.msk.f32.mxu1 %vm1093_vm1, %v754_v51 }
 0x2b2   : > { %2632 = vmatmul.mubr.msk.f32.gmra.mxu1 %vm1093_vm1, %v754_v51 }
 0x2b3   : > { %2633 = vmatprep.mubr.msk.f32.mxu1 %vm1093_vm1, %v759_v48 }
 0x2b6   : > { %2634 = vmatmul.mubr.msk.f32.gmra.mxu1 %vm1093_vm1, %v759_v48 }
 0x2fa   : > { %v3630_v53 = vpop.f32.mrf.mxu1 }
 0x2fb   : > { %4385 = vst [vmem:[#allocation13_spill] sm:$0xff] %v3630_v53 }
 0x2fc   : > { %v3632_v49 = vpop.f32.mrf.mxu1 }
 0x2fd   : > { %4386 = vst [vmem:[#allocation14_spill] sm:$0xff] %v3632_v49  ;;  %v1543_v52 = vmax.f32 %v3630_v53, %v3632_v49 }
 0x2fe   : > { %v3634_v54 = vpop.f32.mrf.mxu1 }
 0x300   : > { %v3636_v45 = vpop.f32.mrf.mxu1 }
 0x301   : > { %v1546_v39 = vmax.f32 %v3634_v54, %v3636_v45 }
 0x302   : > { %v3638_v55 = vpop.f32.mrf.mxu1 }
 0x303   : > { %4387 = vst [vmem:[#allocation15_spill] sm:$0xff] %v3638_v55 }
 0x304   : > { %v3640_v56 = vpop.f32.mrf.mxu1 }
 0x305   : > { %4388 = vst [vmem:[#allocation16_spill] sm:$0xff] %v3640_v56  ;;  %v1549_v38 = vmax.f32 %v3638_v55, %v3640_v56 }
 0x306   : > { %v3642_v46 = vpop.f32.mrf.mxu1 }
 0x308   : > { %v3644_v41 = vpop.f32.mrf.mxu1 }
 0x309   : > { %v1552_v35 = vmax.f32 %v3642_v46, %v3644_v41 }
 0x30a   : > { %v3646_v44 = vpop.f32.mrf.mxu1 }
 0x30c   : > { %v3648_v57 = vpop.f32.mrf.mxu1 }
 0x30d   : > { %4389 = vst [vmem:[#allocation17_spill] sm:$0xff] %v3648_v57  ;;  %v1555_v34 = vmax.f32 %v3646_v44, %v3648_v57 }
 0x30e   : > { %v3650_v47 = vpop.f32.mrf.mxu1 }
 0x310   : > { %v3652_v58 = vpop.f32.mrf.mxu1 }
 0x311   : > { %v1558_v31 = vmax.f32 %v3650_v47, %v3652_v58 }
 0x312   : > { %v3654_v40 = vpop.f32.mrf.mxu1 }
 0x314   : > { %v3656_v59 = vpop.f32.mrf.mxu1 }
 0x315   : > { %v1561_v30 = vmax.f32 %v3654_v40, %v3656_v59 }
 0x316   : > { %v3658_v43 = vpop.f32.mrf.mxu1 }
 0x318   : > { %v3660_v60 = vpop.f32.mrf.mxu1 }
 0x319   : > { %v1564_v27 = vmax.f32 %v3658_v43, %v3660_v60 }
 0x31a   : > { %v3662_v61 = vpop.f32.mrf.mxu1 }
 0x31c   : > { %v3664_v62 = vpop.f32.mrf.mxu1 }
 0x31d   : > { %v1567_v26 = vmax.f32 %v3662_v61, %v3664_v62 }
 0x31e   : > { %v3666_v63 = vpop.f32.mrf.mxu1 }
 0x320   : > { %v3668_v0 = vpop.f32.mrf.mxu1 }
 0x321   : > { %v1570_v23 = vmax.f32 %v3666_v63, %v3668_v0 }
 0x322   : > { %v3670_v1 = vpop.f32.mrf.mxu1 }
 0x324   : > { %v3672_v2 = vpop.f32.mrf.mxu1 }
 0x325   : > { %v1573_v22 = vmax.f32 %v3670_v1, %v3672_v2 }
 0x326   : > { %v3674_v3 = vpop.f32.mrf.mxu1 }
 0x328   : > { %v3676_v4 = vpop.f32.mrf.mxu1 }
 0x329   : > { %v1576_v19 = vmax.f32 %v3674_v3, %v3676_v4 }
 0x32a   : > { %v3678_v5 = vpop.f32.mrf.mxu1 }
 0x32c   : > { %v3680_v6 = vpop.f32.mrf.mxu1 }
 0x32d   : > { %v1579_v18 = vmax.f32 %v3678_v5, %v3680_v6 }
 0x32e   : > { %v3682_v7 = vpop.f32.mrf.mxu1 }
 0x330   : > { %v3684_v8 = vpop.f32.mrf.mxu1 }
 0x331   : > { %v1582_v14 = vmax.f32 %v3682_v7, %v3684_v8 }
 0x332   : > { %v3686_v9 = vpop.f32.mrf.mxu1 }
 0x334   : > { %v3688_v10 = vpop.f32.mrf.mxu1 }
 0x335   : > { %v1585_v11 = vmax.f32 %v3686_v9, %v3688_v10 }
 0x336   : > { %v3692_v12 = vpop.f32.mrf.mxu1 }
 0x337   : > { %1586 = vmax.xlane.f32.xlu1 %v1585_v11 }
 0x338   : > { %v3694_v13 = vpop.f32.mrf.mxu1 }
 0x339   : > { %v1588_v15 = vmax.f32 %v3692_v12, %v3694_v13 }
 0x33a   : > { %v3700_v16 = vpop.f32.mrf.mxu1 }
 0x33b   : > { %4390 = vst [vmem:[#allocation18_spill] sm:$0xff] %v3700_v16  ;;  %1583 = vmax.xlane.f32.xlu1 %v1582_v14  ;;  %1589 = vmax.xlane.f32.xlu0 %v1588_v15 }
 0x33c   : > { %v3702_v17 = vpop.f32.mrf.mxu1 }
 0x33d   : > { %4391 = vst [vmem:[#allocation19_spill] sm:$0xff] %v3702_v17 }
 0x33e   : > { %v3708_v20 = vpop.f32.mrf.mxu1 }
 0x33f   : > { %4392 = vst [vmem:[#allocation20_spill] sm:$0xff] %v3708_v20  ;;  %1580 = vmax.xlane.f32.xlu1 %v1579_v18  ;;  %1577 = vmax.xlane.f32.xlu0 %v1576_v19 }
 0x340   : > { %v3710_v21 = vpop.f32.mrf.mxu1 }
 0x341   : > { %4393 = vst [vmem:[#allocation21_spill] sm:$0xff] %v3710_v21 }
 0x342   : > { %v3716_v24 = vpop.f32.mrf.mxu1 }
 0x343   : > { %4394 = vst [vmem:[#allocation22_spill] sm:$0xff] %v3716_v24  ;;  %1574 = vmax.xlane.f32.xlu1 %v1573_v22  ;;  %1571 = vmax.xlane.f32.xlu0 %v1570_v23 }
 0x344   : > { %v3718_v25 = vpop.f32.mrf.mxu1 }
 0x345   : > { %4395 = vst [vmem:[#allocation23_spill] sm:$0xff] %v3718_v25 }
 0x346   : > { %v3724_v28 = vpop.f32.mrf.mxu1 }
 0x347   : > { %4396 = vst [vmem:[#allocation24_spill] sm:$0xff] %v3724_v28  ;;  %1568 = vmax.xlane.f32.xlu1 %v1567_v26  ;;  %1565 = vmax.xlane.f32.xlu0 %v1564_v27 }
 0x348   : > { %v3726_v29 = vpop.f32.mrf.mxu1 }
 0x349   : > { %4397 = vst [vmem:[#allocation25_spill] sm:$0xff] %v3726_v29 }
 0x34a   : > { %v3732_v32 = vpop.f32.mrf.mxu1 }
 0x34b   : > { %4398 = vst [vmem:[#allocation26_spill] sm:$0xff] %v3732_v32  ;;  %1562 = vmax.xlane.f32.xlu1 %v1561_v30  ;;  %1559 = vmax.xlane.f32.xlu0 %v1558_v31 }
 0x34c   : > { %v3734_v33 = vpop.f32.mrf.mxu1 }
 0x34d   : > { %4399 = vst [vmem:[#allocation27_spill] sm:$0xff] %v3734_v33 }
 0x34e   : > { %v3740_v36 = vpop.f32.mrf.mxu1 }
 0x34f   : > { %1556 = vmax.xlane.f32.xlu1 %v1555_v34  ;;  %1553 = vmax.xlane.f32.xlu0 %v1552_v35 }
 0x350   : > { %v3742_v37 = vpop.f32.mrf.mxu1 }
 0x352   : > { %v3748_v42 = vpop.f32.mrf.mxu1 }
 0x353   : > { %1550 = vmax.xlane.f32.xlu1 %v1549_v38  ;;  %1547 = vmax.xlane.f32.xlu0 %v1546_v39 }
 0x354   : > { %v3750_v50 = vpop.f32.mrf.mxu1 }
 0x356   : > { %v3754_v51 = vpop.f32.mrf.mxu1 }
 0x357   : > { %1544 = vmax.xlane.f32.xlu1 %v1543_v52 }
 0x358   : > { %v3756_v48 = vpop.f32.mrf.mxu1 }
 0x35a   : > { %v3758_v11 = vpop.f32.mrf.mxu1 }
 0x35c   : > { %v3760_v14 = vpop.f32.mrf.mxu1 }
 0x35e   : > { %v3762_v15 = vpop.f32.mrf.mxu1 }
 0x360   : > { %v3764_v18 = vpop.f32.mrf.mxu1 }
 0x362   : > { %v3766_v19 = vpop.f32.mrf.mxu1 }
 0x364   : > { %v3768_v22 = vpop.f32.mrf.mxu1 }
 0x365   : > { %v1621_v55 = vmax.f32 %v3766_v19, %v3768_v22 }
 0x366   : > { %v3770_v23 = vpop.f32.mrf.mxu1 }
 0x368   : > { %v3772_v26 = vpop.f32.mrf.mxu1 }
 0x36a   : > { %v3774_v27 = vpop.f32.mrf.mxu1 }
 0x36c   : > { %v3776_v30 = vpop.f32.mrf.mxu1 }
 0x36d   : > { %v1627_v56 = vmax.f32 %v3774_v27, %v3776_v30 }
 0x36e   : > { %v3778_v31 = vpop.f32.mrf.mxu1 }
 0x370   : > { %v3780_v34 = vpop.f32.mrf.mxu1 }
 0x371   : > { %v1630_v57 = vmax.f32 %v3778_v31, %v3780_v34 }
 0x372   : > { %v3782_v35 = vpop.f32.mrf.mxu1 }
 0x374   : > { %v3784_v38 = vpop.f32.mrf.mxu1 }
 0x375   : > { %v1633_v39 = vmax.f32 %v3782_v35, %v3784_v38 }
 0x376   : > { %v3788_v52 = vpop.f32.mrf.mxu1 }
 0x377   : > { %1634 = vmax.xlane.f32.xlu1 %v1633_v39  ;;  %v1624_v39 = vmax.f32 %v3770_v23, %v3772_v26 }
 0x378   : > { %v3790_v49 = vpop.f32.mrf.mxu1 }
 0x379   : > { %4400 = vst [vmem:[#allocation28_spill] sm:$0xff] %v3790_v49  ;;  %v1636_v53 = vmax.f32 %v3788_v52, %v3790_v49  ;;  %v1618_v49 = vmax.f32 %v3762_v15, %v3764_v18 }
 0x37b   : > { %1628 = vmax.xlane.f32.xlu1 %v1627_v56  ;;  %1637 = vmax.xlane.f32.xlu0 %v1636_v53  ;;  %v1615_v56 = vmax.f32 %v3758_v11, %v3760_v14  ;;  %v1612_v53 = vmax.f32 %v3754_v51, %v3756_v48 }
 0x37f   : > { %1622 = vmax.xlane.f32.xlu1 %v1621_v55  ;;  %1631 = vmax.xlane.f32.xlu0 %v1630_v57  ;;  %v1609_v55 = vmax.f32 %v3748_v42, %v3750_v50  ;;  %v1606_v57 = vmax.f32 %v3740_v36, %v3742_v37 }
 0x383   : > { %1625 = vmax.xlane.f32.xlu0 %v1624_v39  ;;  %v1603_v39 = vmax.f32 %v3732_v32, %v3734_v33 }
 0x387   : > { %1619 = vmax.xlane.f32.xlu0 %v1618_v49  ;;  %v1600_v49 = vmax.f32 %v3724_v28, %v3726_v29 }
 0x38b   : > { %1616 = vmax.xlane.f32.xlu0 %v1615_v56  ;;  %v1597_v56 = vmax.f32 %v3716_v24, %v3718_v25 }
 0x38f   : > { %1613 = vmax.xlane.f32.xlu0 %v1612_v53  ;;  %v1594_v53 = vmax.f32 %v3708_v20, %v3710_v21 }
 0x393   : > { %1610 = vmax.xlane.f32.xlu0 %v1609_v55  ;;  %v1591_v55 = vmax.f32 %v3700_v16, %v3702_v17 }
 0x397   : > { %1607 = vmax.xlane.f32.xlu0 %v1606_v57  ;;  %v3125_v57 = vmov 0.0  }
 0x398   : > { %1080 = vmatprep.mubr.f32.mxu0 %v3125_v57 }
 0x39b   : > { %1604 = vmax.xlane.f32.xlu0 %v1603_v39  ;;  %v996_v39 = vld [vmem:[%s4343_s5] sm:$0xff] }
 0x39c   : > { %2394 = vmatmul.mubr.msk.f32.vlgmr.msra.gmra.mxu0 %vm440_vm0, %v996_v39 }
 0x39d   : > { %1086 = vmatprep.mubr.f32.mxu0 %v3125_v57 }
 0x39f   : > { %1601 = vmax.xlane.f32.xlu0 %v1600_v49  ;;  %v997_v49 = vld [vmem:[%s4343_s5 + $0x8] sm:$0xff] }
 0x3a0   : > { %2395 = vmatmul.mubr.msk.f32.gmra.mxu0 %vm440_vm0, %v997_v49 }
 0x3a3   : > { %1598 = vmax.xlane.f32.xlu0 %v1597_v56 }
 0x3a7   : > { %1595 = vmax.xlane.f32.xlu0 %v1594_v53 }
 0x3ab   : > { %1592 = vmax.xlane.f32.xlu0 %v1591_v55 }
 0x3c0   : > { %v1587_v56 = vpop.xlane.xlu1 %1586 }
 0x3c1   : > { %v1667_v55 = vsub.f32 %v3686_v9, %v1587_v56  ;;  %v1668_v16 = vsub.f32 %v3688_v10, %v1587_v56 }
 0x3c3   : > { %v1759_v24 = vmul.f32 1.442695, %v1667_v55  ;;  %v1761_v28 = vmul.f32 1.442695, %v1668_v16 }
 0x3c4   : > { %v1584_v53 = vpop.xlane.xlu1 %1583  ;;  %v1590_v21 = vpop.xlane.xlu0 %1589 }
 0x3c5   : > { %v1669_v17 = vsub.f32 %v3692_v12, %v1590_v21  ;;  %v1670_v20 = vsub.f32 %v3694_v13, %v1590_v21  ;;  %v1665_v29 = vsub.f32 %v3682_v7, %v1584_v53  ;;  %v1666_v49 = vsub.f32 %v3684_v8, %v1584_v53 }
 0x3c7   : > { %v1763_v25 = vmul.f32 1.442695, %v1669_v17  ;;  %v1765_v39 = vmul.f32 1.442695, %v1670_v20  ;;  %v1755_v9 = vmul.f32 1.442695, %v1665_v29 }
 0x3c8   : > { %v1578_v57 = vpop.xlane.xlu0 %1577  ;;  %v1581_v33 = vpop.xlane.xlu1 %1580  ;;  %v1757_v10 = vmul.f32 1.442695, %v1666_v49 }
 0x3c9   : > { %2802 = vpow2.f32 %v1763_v25  ;;  %v1663_v12 = vsub.f32 %v3678_v5, %v1581_v33  ;;  %v1664_v13 = vsub.f32 %v3680_v6, %v1581_v33  ;;  %v1661_v16 = vsub.f32 %v3674_v3, %v1578_v57 }
 0x3ca   : > { %2804 = vpow2.f32 %v1765_v39  ;;  %v1662_v21 = vsub.f32 %v3676_v4, %v1578_v57 }
 0x3cb   : > { %2806 = vpow2.f32 %v1759_v24  ;;  %v1751_v7 = vmul.f32 1.442695, %v1663_v12  ;;  %v1753_v8 = vmul.f32 1.442695, %v1664_v13  ;;  %v1747_v24 = vmul.f32 1.442695, %v1661_v16 }
 0x3cc   : > { %v1572_v32 = vpop.xlane.xlu0 %1571  ;;  %2808 = vpow2.f32 %v1761_v28  ;;  %v1575_v17 = vpop.xlane.xlu1 %1574  ;;  %v1749_v6 = vmul.f32 1.442695, %v1662_v21 }
 0x3cd   : > { %2810 = vpow2.f32 %v1755_v9  ;;  %v1659_v5 = vsub.f32 %v3670_v1, %v1575_v17  ;;  %v1660_v29 = vsub.f32 %v3672_v2, %v1575_v17  ;;  %v1657_v55 = vsub.f32 %v3666_v63, %v1572_v32 }
 0x3ce   : > { %2812 = vpow2.f32 %v1757_v10 }
 0x3cf   : > { %2814 = vpow2.f32 %v1751_v7  ;;  %v1743_v1 = vmul.f32 1.442695, %v1659_v5  ;;  %v1745_v2 = vmul.f32 1.442695, %v1660_v29  ;;  %v1739_v13 = vmul.f32 1.442695, %v1657_v55 }
 0x3d0   : > { %v3838_v20 = vpop.xlane.xlu0 %1565  ;;  %2816 = vpow2.f32 %v1753_v8  ;;  %v1569_v33 = vpop.xlane.xlu1 %1568 }
 0x3d1   : > { %2818 = vpow2.f32 %v1747_v24  ;;  %v1656_v8 = vsub.f32 %v3664_v62, %v1569_v33 }
 0x3d2   : > { %2820 = vpow2.f32 %v1749_v6 }
 0x3d3   : > { %v1737_v62 = vmul.f32 1.442695, %v1656_v8 }
 0x3d4   : > { %v1560_v25 = vpop.xlane.xlu0 %1559  ;;  %v1563_v17 = vpop.xlane.xlu1 %1562 }
 0x3d5   : > { %v1649_v28 = vsub.f32 %v3650_v47, %v1560_v25  ;;  %v1650_v56 = vsub.f32 %v3652_v58, %v1560_v25  ;;  %v1658_v47 = vsub.f32 %v3668_v0, %v1572_v32  ;;  %v1655_v32 = vsub.f32 %v3662_v61, %v1569_v33 }
 0x3d6   : > { %v3846_v3 = vpop.eup %2802 }
 0x3d7   : > { %v1723_v53 = vmul.f32 1.442695, %v1649_v28  ;;  %v1725_v4 = vmul.f32 1.442695, %v1650_v56  ;;  %v3849_v57 = vpop.eup %2804  ;;  %v1735_v61 = vmul.f32 1.442695, %v1655_v32 }
 0x3d8   : > { %v1554_v39 = vpop.xlane.xlu0 %1553  ;;  %v3853_v9 = vpop.eup %2806  ;;  %v1876_v12 = vadd.f32 %v3849_v57, %v3846_v3 }
 0x3d9   : > { %v1645_v49 = vsub.f32 %v3642_v46, %v1554_v39  ;;  %v1646_v58 = vsub.f32 %v3644_v41, %v1554_v39  ;;  %v3858_v63 = vpop.eup %2808  ;;  %2822 = vpow2.f32 %v1723_v53  ;;  %v1741_v46 = vmul.f32 1.442695, %v1658_v47  ;;  %v1557_v29 = vpop.xlane.xlu1 %1556 }
 0x3da   : > { %2824 = vpow2.f32 %v1725_v4  ;;  %1877 = vadd.xlane.f32.xlu1 %v1876_v12  ;;  %v3862_v41 = vpop.eup %2810  ;;  %v1873_v25 = vadd.f32 %v3858_v63, %v3853_v9  ;;  %v1652_v39 = vsub.f32 %v3656_v59, %v1563_v17  ;;  %v1647_v47 = vsub.f32 %v3646_v44, %v1557_v29 }
 0x3db   : > { %v1715_v10 = vmul.f32 1.442695, %v1645_v49  ;;  %v1717_v7 = vmul.f32 1.442695, %v1646_v58  ;;  %2826 = vpow2.f32 %v1743_v1  ;;  %v3868_v24 = vpop.eup %2812  ;;  %v4401_v58 = vld [vmem:[#allocation17_spill] sm:$0xff] }
 0x3dc   : > { %v1548_v0 = vpop.xlane.xlu0 %1547  ;;  %2828 = vpow2.f32 %v1745_v2  ;;  %v3872_v6 = vpop.eup %2814  ;;  %v1870_v33 = vadd.f32 %v3868_v24, %v3862_v41  ;;  %v1648_v12 = vsub.f32 %v4401_v58, %v1557_v29  ;;  %v1729_v59 = vmul.f32 1.442695, %v1652_v39 }
 0x3dd   : > { %v1641_v16 = vsub.f32 %v3634_v54, %v1548_v0  ;;  %v1642_v21 = vsub.f32 %v3636_v45, %v1548_v0  ;;  %2830 = vpow2.f32 %v1715_v10  ;;  %v1653_v54 = vsub.f32 %v3658_v43, %v3838_v20  ;;  %v3878_v56 = vpop.eup %2816  ;;  %v1551_v49 = vpop.xlane.xlu1 %1550 }
 0x3de   : > { %2832 = vpow2.f32 %v1717_v7  ;;  %1874 = vadd.xlane.f32.xlu1 %v1873_v25  ;;  %v1654_v45 = vsub.f32 %v3660_v60, %v3838_v20  ;;  %v1651_v43 = vsub.f32 %v3654_v40, %v1563_v17  ;;  %v3881_v55 = vpop.eup %2818  ;;  %v1867_v60 = vadd.f32 %v3878_v56, %v3872_v6 }
 0x3df   : > { %v1707_v5 = vmul.f32 1.442695, %v1641_v16  ;;  %v1709_v28 = vmul.f32 1.442695, %v1642_v21  ;;  %2834 = vpow2.f32 %v1739_v13  ;;  %v1731_v53 = vmul.f32 1.442695, %v1653_v54  ;;  %v3886_v20 = vpop.eup %2820 }
 0x3e0   : > { %2836 = vpow2.f32 %v1741_v46  ;;  %v1733_v4 = vmul.f32 1.442695, %v1654_v45  ;;  %v1727_v40 = vmul.f32 1.442695, %v1651_v43  ;;  %v1864_v13 = vadd.f32 %v3886_v20, %v3881_v55  ;;  %v4402_v16 = vld [vmem:[#allocation15_spill] sm:$0xff]  ;;  %v4403_v21 = vld [vmem:[#allocation16_spill] sm:$0xff] }
 0x3e1   : > { %2838 = vpow2.f32 %v1707_v5  ;;  %v1719_v0 = vmul.f32 1.442695, %v1647_v47  ;;  %v1721_v32 = vmul.f32 1.442695, %v1648_v12  ;;  %v1643_v8 = vsub.f32 %v4402_v16, %v1551_v49  ;;  %v4404_v43 = vld [vmem:[#allocation13_spill] sm:$0xff] }
 0x3e2   : > { %2840 = vpow2.f32 %v1709_v28  ;;  %1871 = vadd.xlane.f32.xlu1 %v1870_v33  ;;  %v1644_v25 = vsub.f32 %v4403_v21, %v1551_v49  ;;  %v1545_v28 = vpop.xlane.xlu1 %1544  ;;  %v3126_v12 = vmov 0  }
 0x3e3   : > { %2842 = vpow2.f32 %v1735_v61  ;;  %v1711_v33 = vmul.f32 1.442695, %v1643_v8  ;;  %2800 = vset.pattern.permute.xlu0 %v3126_v12  ;;  %2801 = vset.pattern.permute.xlu1 %v3126_v12 }
 0x3e4   : > { %2844 = vpow2.f32 %v1737_v62 }
 0x3e5   : > { %2846 = vpow2.f32 %v1731_v53  ;;  %v1713_v53 = vmul.f32 1.442695, %v1644_v25 }
 0x3e6   : > { %v3888_v1 = vpop.eup %2822  ;;  %1868 = vadd.xlane.f32.xlu1 %v1867_v60  ;;  %2848 = vpow2.f32 %v1733_v4  ;;  %v1639_v4 = vsub.f32 %v4404_v43, %v1545_v28  ;;  %v4405_v60 = vld [vmem:[#allocation14_spill] sm:$0xff] }
 0x3e7   : > { %v3891_v2 = vpop.eup %2824  ;;  %2850 = vpow2.f32 %v1727_v40  ;;  %v1640_v47 = vsub.f32 %v4405_v60, %v1545_v28 }
 0x3e8   : > { %v3894_v10 = vpop.eup %2826  ;;  %v1846_v17 = vadd.f32 %v3891_v2, %v3888_v1  ;;  %2852 = vpow2.f32 %v1729_v59  ;;  %v1703_v59 = vmul.f32 1.442695, %v1639_v4 }
 0x3e9   : > { %v3900_v7 = vpop.eup %2828  ;;  %2854 = vpow2.f32 %v1719_v0 }
 0x3ea   : > { %v3902_v44 = vpop.eup %2830  ;;  %1865 = vadd.xlane.f32.xlu1 %v1864_v13  ;;  %1847 = vadd.xlane.f32.xlu0 %v1846_v17  ;;  %v1861_v61 = vadd.f32 %v3900_v7, %v3894_v10  ;;  %2856 = vpow2.f32 %v1721_v32  ;;  %v1705_v17 = vmul.f32 1.442695, %v1640_v47 }
 0x3eb   : > { %v3904_v46 = vpop.eup %2832  ;;  %2858 = vpow2.f32 %v1711_v33 }
 0x3ec   : > { %v3908_v5 = vpop.eup %2834  ;;  %v1840_v54 = vadd.f32 %v3904_v46, %v3902_v44  ;;  %2860 = vpow2.f32 %v1713_v53 }
 0x3ed   : > { %v3914_v62 = vpop.eup %2836  ;;  %2862 = vpow2.f32 %v1703_v59 }
 0x3ee   : > { %v3916_v45 = vpop.eup %2838  ;;  %1862 = vadd.xlane.f32.xlu1 %v1861_v61  ;;  %1841 = vadd.xlane.f32.xlu0 %v1840_v54  ;;  %v1858_v49 = vadd.f32 %v3914_v62, %v3908_v5  ;;  %2864 = vpow2.f32 %v1705_v17 }
 0x3ef   : > { %v3918_v29 = vpop.eup %2840 }
 0x3f0   : > { %v3921_v39 = vpop.eup %2842  ;;  %v1834_v40 = vadd.f32 %v3918_v29, %v3916_v45 }
 0x3f1   : > { %v3928_v58 = vpop.eup %2844 }
 0x3f2   : > { %1859 = vadd.xlane.f32.xlu1 %v1858_v49  ;;  %1835 = vadd.xlane.f32.xlu0 %v1834_v40  ;;  %v3930_v13 = vpop.eup %2846  ;;  %v1855_v0 = vadd.f32 %v3928_v58, %v3921_v39 }
 0x3f3   : > { %v3934_v32 = vpop.eup %2848 }
 0x3f4   : > { %v3936_v16 = vpop.eup %2850  ;;  %v1852_v8 = vadd.f32 %v3934_v32, %v3930_v13 }
 0x3f5   : > { %v3940_v21 = vpop.eup %2852 }
 0x3f6   : > { %1856 = vadd.xlane.f32.xlu1 %v1855_v0  ;;  %v3942_v25 = vpop.eup %2854  ;;  %v1849_v61 = vadd.f32 %v3940_v21, %v3936_v16  ;;  %v4407_v0 = vld [vmem:[#allocation28_spill] sm:$0xff] }
 0x3f7   : > { %4406 = vst [vmem:[#allocation17_spill] sm:$0xff] %v3942_v25  ;;  %v3944_v28 = vpop.eup %2856 }
 0x3f8   : > { %v3950_v43 = vpop.eup %2858  ;;  %v1843_v4 = vadd.f32 %v3944_v28, %v3942_v25 }
 0x3f9   : > { %v3954_v60 = vpop.eup %2860 }
 0x3fa   : > { %1853 = vadd.xlane.f32.xlu1 %v1852_v8 }
 0x3fe   : > { %1850 = vadd.xlane.f32.xlu1 %v1849_v61  ;;  %v1837_v61 = vadd.f32 %v3954_v60, %v3950_v43 }
 0x400   : > { %v1635_v54 = vpop.xlane.xlu1 %1634 }
 0x401   : > { %v1699_v33 = vsub.f32 %v3782_v35, %v1635_v54  ;;  %v1700_v53 = vsub.f32 %v3784_v38, %v1635_v54  ;;  %v3959_v38 = vpop.eup %2862 }
 0x402   : > { %1844 = vadd.xlane.f32.xlu1 %v1843_v4  ;;  %v3964_v54 = vpop.eup %2864 }
 0x403   : > { %v1823_v47 = vmul.f32 1.442695, %v1699_v33  ;;  %v1825_v49 = vmul.f32 1.442695, %v1700_v53 }
 0x404   : > { %v1629_v40 = vpop.xlane.xlu1 %1628  ;;  %v1638_v12 = vpop.xlane.xlu0 %1637 }
 0x405   : > { %2866 = vpow2.f32 %v1823_v47  ;;  %v1695_v59 = vsub.f32 %v3774_v27, %v1629_v40  ;;  %v1696_v17 = vsub.f32 %v3776_v30, %v1629_v40  ;;  %v1701_v35 = vsub.f32 %v3788_v52, %v1638_v12 }
 0x406   : > { %2868 = vpow2.f32 %v1825_v49  ;;  %v1702_v8 = vsub.f32 %v4407_v0, %v1638_v12  ;;  %1838 = vadd.xlane.f32.xlu1 %v1837_v61  ;;  %v1831_v12 = vadd.f32 %v3964_v54, %v3959_v38 }
 0x407   : > { %v1815_v33 = vmul.f32 1.442695, %v1695_v59  ;;  %v1817_v53 = vmul.f32 1.442695, %v1696_v17  ;;  %v1827_v4 = vmul.f32 1.442695, %v1701_v35 }
 0x408   : > { %v1829_v47 = vmul.f32 1.442695, %v1702_v8  ;;  %v1623_v27 = vpop.xlane.xlu1 %1622  ;;  %v1632_v25 = vpop.xlane.xlu0 %1631 }
 0x409   : > { %2870 = vpow2.f32 %v1815_v33  ;;  %v1691_v30 = vsub.f32 %v3766_v19, %v1623_v27  ;;  %v1692_v52 = vsub.f32 %v3768_v22, %v1623_v27  ;;  %v1697_v49 = vsub.f32 %v3778_v31, %v1632_v25 }
 0x40a   : > { %2872 = vpow2.f32 %v1817_v53  ;;  %v1698_v40 = vsub.f32 %v3780_v34, %v1632_v25  ;;  %1832 = vadd.xlane.f32.xlu1 %v1831_v12 }
 0x40b   : > { %2874 = vpow2.f32 %v1827_v4  ;;  %v1807_v59 = vmul.f32 1.442695, %v1691_v30  ;;  %v1809_v17 = vmul.f32 1.442695, %v1692_v52  ;;  %v1819_v35 = vmul.f32 1.442695, %v1697_v49 }
 0x40c   : > { %2876 = vpow2.f32 %v1829_v47  ;;  %v1821_v0 = vmul.f32 1.442695, %v1698_v40  ;;  %v1626_v8 = vpop.xlane.xlu0 %1625 }
 0x40d   : > { %2878 = vpow2.f32 %v1807_v59  ;;  %v1693_v19 = vsub.f32 %v3770_v23, %v1626_v8  ;;  %v1694_v22 = vsub.f32 %v3772_v26, %v1626_v8 }
 0x40e   : > { %2880 = vpow2.f32 %v1809_v17 }
 0x40f   : > { %2882 = vpow2.f32 %v1819_v35  ;;  %v1811_v31 = vmul.f32 1.442695, %v1693_v19  ;;  %v1813_v34 = vmul.f32 1.442695, %v1694_v22 }
 0x410   : > { %2884 = vpow2.f32 %v1821_v0  ;;  %v1620_v25 = vpop.xlane.xlu0 %1619 }
 0x411   : > { %2886 = vpow2.f32 %v1811_v31  ;;  %v1689_v61 = vsub.f32 %v3762_v15, %v1620_v25  ;;  %v1690_v33 = vsub.f32 %v3764_v18, %v1620_v25 }
 0x412   : > { %v3976_v53 = vpop.eup %2866  ;;  %2888 = vpow2.f32 %v1813_v34 }
 0x413   : > { %v3978_v4 = vpop.eup %2868  ;;  %v1803_v47 = vmul.f32 1.442695, %v1689_v61  ;;  %v1805_v23 = vmul.f32 1.442695, %v1690_v33 }
 0x414   : > { %v1617_v27 = vpop.xlane.xlu0 %1616  ;;  %v1921_v26 = vadd.f32 %v3978_v4, %v3976_v53 }
 0x415   : > { %2890 = vpow2.f32 %v1803_v47  ;;  %v1687_v30 = vsub.f32 %v3758_v11, %v1617_v27  ;;  %v1688_v52 = vsub.f32 %v3760_v14, %v1617_v27 }
 0x416   : > { %v3984_v49 = vpop.eup %2870  ;;  %2892 = vpow2.f32 %v1805_v23  ;;  %1922 = vadd.xlane.f32.xlu1 %v1921_v26 }
 0x417   : > { %v3986_v15 = vpop.eup %2872  ;;  %v1799_v18 = vmul.f32 1.442695, %v1687_v30  ;;  %v1801_v40 = vmul.f32 1.442695, %v1688_v52 }
 0x418   : > { %v3988_v12 = vpop.eup %2874  ;;  %v1614_v59 = vpop.xlane.xlu0 %1613  ;;  %v1915_v17 = vadd.f32 %v3986_v15, %v3984_v49 }
 0x419   : > { %v3992_v35 = vpop.eup %2876  ;;  %2894 = vpow2.f32 %v1799_v18  ;;  %v1685_v11 = vsub.f32 %v3754_v51, %v1614_v59  ;;  %v1686_v14 = vsub.f32 %v3756_v48, %v1614_v59 }
 0x41a   : > { %v3996_v0 = vpop.eup %2878  ;;  %2896 = vpow2.f32 %v1801_v40  ;;  %1916 = vadd.xlane.f32.xlu1 %v1915_v17  ;;  %v1924_v8 = vadd.f32 %v3992_v35, %v3988_v12 }
 0x41b   : > { %v4000_v19 = vpop.eup %2880  ;;  %v1795_v22 = vmul.f32 1.442695, %v1685_v11  ;;  %v1797_v31 = vmul.f32 1.442695, %v1686_v14 }
 0x41c   : > { %v4002_v34 = vpop.eup %2882  ;;  %1925 = vadd.xlane.f32.xlu0 %v1924_v8  ;;  %v1611_v25 = vpop.xlane.xlu0 %1610  ;;  %v1909_v51 = vadd.f32 %v4000_v19, %v3996_v0 }
 0x41d   : > { %v4006_v61 = vpop.eup %2884  ;;  %2898 = vpow2.f32 %v1795_v22  ;;  %v1683_v48 = vsub.f32 %v3748_v42, %v1611_v25  ;;  %v1684_v33 = vsub.f32 %v3750_v50, %v1611_v25  ;;  %v4408_v22 = vld [vmem:[#allocation26_spill] sm:$0xff]  ;;  %v4409_v25 = vld [vmem:[#allocation27_spill] sm:$0xff] }
 0x41e   : > { %v4010_v47 = vpop.eup %2886  ;;  %2900 = vpow2.f32 %v1797_v31  ;;  %1910 = vadd.xlane.f32.xlu1 %v1909_v51  ;;  %v1918_v23 = vadd.f32 %v4006_v61, %v4002_v34 }
 0x41f   : > { %v4014_v27 = vpop.eup %2888  ;;  %v1791_v26 = vmul.f32 1.442695, %v1683_v48  ;;  %v1793_v30 = vmul.f32 1.442695, %v1684_v33 }
 0x420   : > { %1919 = vadd.xlane.f32.xlu0 %v1918_v23  ;;  %v1608_v52 = vpop.xlane.xlu0 %1607  ;;  %v1912_v18 = vadd.f32 %v4014_v27, %v4010_v47 }
 0x421   : > { %2902 = vpow2.f32 %v1791_v26  ;;  %v1681_v42 = vsub.f32 %v3740_v36, %v1608_v52  ;;  %v1682_v50 = vsub.f32 %v3742_v37, %v1608_v52 }
 0x422   : > { %v4020_v40 = vpop.eup %2890  ;;  %2904 = vpow2.f32 %v1793_v30  ;;  %v4410_v30 = vld [vmem:[#allocation24_spill] sm:$0xff] }
 0x423   : > { %v4022_v59 = vpop.eup %2892  ;;  %v1787_v17 = vmul.f32 1.442695, %v1681_v42  ;;  %v1789_v11 = vmul.f32 1.442695, %v1682_v50 }
 0x424   : > { %1913 = vadd.xlane.f32.xlu0 %v1912_v18  ;;  %v1605_v14 = vpop.xlane.xlu0 %1604  ;;  %v1906_v8 = vadd.f32 %v4022_v59, %v4020_v40  ;;  %v4411_v18 = vld [vmem:[#allocation25_spill] sm:$0xff] }
 0x425   : > { %2906 = vpow2.f32 %v1787_v17  ;;  %v1679_v31 = vsub.f32 %v4408_v22, %v1605_v14  ;;  %v1680_v51 = vsub.f32 %v4409_v25, %v1605_v14 }
 0x426   : > { %v4028_v36 = vpop.eup %2894  ;;  %2908 = vpow2.f32 %v1789_v11 }
 0x427   : > { %v4030_v37 = vpop.eup %2896  ;;  %v1783_v48 = vmul.f32 1.442695, %v1679_v31  ;;  %v1785_v33 = vmul.f32 1.442695, %v1680_v51  ;;  %v4414_v31 = vld [vmem:[#allocation22_spill] sm:$0xff]  ;;  %v4415_v51 = vld [vmem:[#allocation23_spill] sm:$0xff] }
 0x428   : > { %1907 = vadd.xlane.f32.xlu0 %v1906_v8  ;;  %v1602_v23 = vpop.xlane.xlu0 %1601  ;;  %v1903_v26 = vadd.f32 %v4030_v37, %v4028_v36 }
 0x429   : > { %2910 = vpow2.f32 %v1783_v48  ;;  %v1677_v52 = vsub.f32 %v4410_v30, %v1602_v23  ;;  %v1678_v42 = vsub.f32 %v4411_v18, %v1602_v23 }
 0x42a   : > { %v4036_v50 = vpop.eup %2898  ;;  %2912 = vpow2.f32 %v1785_v33  ;;  %1904 = vadd.xlane.f32.xlu1 %v1903_v26 }
 0x42b   : > { %4412 = vst [vmem:[#allocation15_spill] sm:$0xff] %v4036_v50  ;;  %v4038_v17 = vpop.eup %2900  ;;  %v1779_v11 = vmul.f32 1.442695, %v1677_v52  ;;  %v1781_v14 = vmul.f32 1.442695, %v1678_v42  ;;  %v4418_v42 = vld [vmem:[#allocation20_spill] sm:$0xff] }
 0x42c   : > { %4413 = vst [vmem:[#allocation16_spill] sm:$0xff] %v4038_v17  ;;  %v1599_v22 = vpop.xlane.xlu0 %1598  ;;  %v1900_v8 = vadd.f32 %v4038_v17, %v4036_v50 }
 0x42d   : > { %2914 = vpow2.f32 %v1779_v11  ;;  %v1675_v25 = vsub.f32 %v4414_v31, %v1599_v22  ;;  %v1676_v48 = vsub.f32 %v4415_v51, %v1599_v22  ;;  %v4419_v11 = vld [vmem:[#allocation21_spill] sm:$0xff] }
 0x42e   : > { %v4044_v30 = vpop.eup %2902  ;;  %2916 = vpow2.f32 %v1781_v14  ;;  %1901 = vadd.xlane.f32.xlu0 %v1900_v8 }
 0x42f   : > { %4416 = vst [vmem:[#allocation13_spill] sm:$0xff] %v4044_v30  ;;  %v4046_v23 = vpop.eup %2904  ;;  %v1775_v33 = vmul.f32 1.442695, %v1675_v25  ;;  %v1777_v26 = vmul.f32 1.442695, %v1676_v48  ;;  %v4420_v48 = vld [vmem:[#allocation18_spill] sm:$0xff] }
 0x430   : > { %4417 = vst [vmem:[#allocation14_spill] sm:$0xff] %v4046_v23  ;;  %v1596_v18 = vpop.xlane.xlu0 %1595  ;;  %v1897_v52 = vadd.f32 %v4046_v23, %v4044_v30 }
 0x431   : > { %2918 = vpow2.f32 %v1775_v33  ;;  %v1673_v50 = vsub.f32 %v4418_v42, %v1596_v18  ;;  %v1674_v17 = vsub.f32 %v4419_v11, %v1596_v18  ;;  %v4421_v33 = vld [vmem:[#allocation19_spill] sm:$0xff] }
 0x432   : > { %v4052_v31 = vpop.eup %2906  ;;  %2920 = vpow2.f32 %v1777_v26  ;;  %1898 = vadd.xlane.f32.xlu1 %v1897_v52 }
 0x433   : > { %v4054_v22 = vpop.eup %2908  ;;  %v1771_v14 = vmul.f32 1.442695, %v1673_v50  ;;  %v1773_v8 = vmul.f32 1.442695, %v1674_v17 }
 0x434   : > { %v1593_v51 = vpop.xlane.xlu0 %1592  ;;  %v1894_v25 = vadd.f32 %v4054_v22, %v4052_v31 }
 0x435   : > { %2922 = vpow2.f32 %v1771_v14  ;;  %v1671_v30 = vsub.f32 %v4420_v48, %v1593_v51  ;;  %v1672_v23 = vsub.f32 %v4421_v33, %v1593_v51 }
 0x436   : > { %v4060_v42 = vpop.eup %2910  ;;  %2924 = vpow2.f32 %v1773_v8  ;;  %1895 = vadd.xlane.f32.xlu0 %v1894_v25 }
 0x437   : > { %v4062_v18 = vpop.eup %2912  ;;  %v1767_v26 = vmul.f32 1.442695, %v1671_v30  ;;  %v1769_v52 = vmul.f32 1.442695, %v1672_v23 }
 0x438   : > { %v1891_v50 = vadd.f32 %v4062_v18, %v4060_v42 }
 0x439   : > { %2926 = vpow2.f32 %v1767_v26 }
 0x43a   : > { %v4066_v17 = vpop.eup %2914  ;;  %2928 = vpow2.f32 %v1769_v52  ;;  %1892 = vadd.xlane.f32.xlu1 %v1891_v50  ;;  %v999_v50 = vld [vmem:[%s4344_s6 + $0x8] sm:$0xff] }
 0x43b   : > { %v4068_v11 = vpop.eup %2916 }
 0x43c   : > { %v1888_v14 = vadd.f32 %v4068_v11, %v4066_v17 }
 0x43e   : > { %v4072_v51 = vpop.eup %2918  ;;  %1889 = vadd.xlane.f32.xlu0 %v1888_v14  ;;  %v998_v14 = vld [vmem:[%s4344_s6] sm:$0xff] }
 0x43f   : > { %4422 = vst [vmem:[#allocation28_spill] sm:$0xff] %v4072_v51  ;;  %v4074_v8 = vpop.eup %2920 }
 0x440   : > { %4423 = vst [vmem:[#allocation26_spill] sm:$0xff] %v4074_v8  ;;  %v1885_v30 = vadd.f32 %v4074_v8, %v4072_v51 }
 0x442   : > { %v4078_v23 = vpop.eup %2922  ;;  %1886 = vadd.xlane.f32.xlu1 %v1885_v30 }
 0x443   : > { %4424 = vst [vmem:[#allocation27_spill] sm:$0xff] %v4078_v23  ;;  %v4080_v25 = vpop.eup %2924 }
 0x444   : > { %4425 = vst [vmem:[#allocation24_spill] sm:$0xff] %v4080_v25  ;;  %v1882_v48 = vadd.f32 %v4080_v25, %v4078_v23 }
 0x446   : > { %v4084_v33 = vpop.eup %2926  ;;  %1883 = vadd.xlane.f32.xlu0 %v1882_v48 }
 0x447   : > { %4426 = vst [vmem:[#allocation25_spill] sm:$0xff] %v4084_v33  ;;  %v4086_v26 = vpop.eup %2928 }
 0x448   : > { %4427 = vst [vmem:[#allocation22_spill] sm:$0xff] %v4086_v26  ;;  %v1879_v52 = vadd.f32 %v4086_v26, %v4084_v33 }
 0x44a   : > { %1880 = vadd.xlane.f32.xlu1 %v1879_v52 }
 0x45b   : > { %1007 = vperm.xlu1 %2801, %v999_v50  }
 0x45c   : > { %1002 = vperm.xlu0 %2800, %v998_v14  }
 0x463   : > { %v1878_v30 = vpop.xlane.xlu1 %1877 }
 0x464   : > { %2930 = vrcp.f32 %v1878_v30 }
 0x467   : > { %v1875_v23 = vpop.xlane.xlu1 %1874 }
 0x468   : > { %2932 = vrcp.f32 %v1875_v23 }
 0x46b   : > { %v1872_v48 = vpop.xlane.xlu1 %1871 }
 0x46c   : > { %2934 = vrcp.f32 %v1872_v48 }
 0x46f   : > { %v1869_v25 = vpop.xlane.xlu1 %1868 }
 0x470   : > { %2936 = vrcp.f32 %v1869_v25 }
 0x471   : > { %v2931_v52 = vpop.eup %2930 }
 0x472   : > { %v1990_v33 = vmul.f32 %v2931_v52, %v3849_v57  ;;  %v1989_v26 = vmul.f32 %v2931_v52, %v3846_v3 }
 0x473   : > { %v1866_v51 = vpop.xlane.xlu1 %1865  ;;  %v1848_v8 = vpop.xlane.xlu0 %1847 }
 0x474   : > { %2938 = vrcp.f32 %v1866_v51  ;;  %2023 = vmatprep.subr.mxu0 %v1990_v33  ;;  %2145 = vst [vmem:[%s4099_s20 + $0xf8] sm:$0xff] %v1990_v33  ;;  %2144 = vst [vmem:[%s4099_s20 + $0xf0] sm:$0xff] %v1989_v26 }
 0x475   : > { %v2933_v23 = vpop.eup %2932  ;;  %2940 = vrcp.f32 %v1848_v8  ;;  %2024 = vmatpush1.xpose.msra.mxu0 %v1989_v26 }
 0x476   : > { %v1988_v25 = vmul.f32 %v2933_v23, %v3858_v63  ;;  %v1987_v57 = vmul.f32 %v2933_v23, %v3853_v9 }
 0x477   : > { %v1863_v3 = vpop.xlane.xlu1 %1862  ;;  %v1842_v51 = vpop.xlane.xlu0 %1841 }
 0x478   : > { %2942 = vrcp.f32 %v1863_v3  ;;  %2025 = vmatprep.subr.mxu0 %v1988_v25  ;;  %2143 = vst [vmem:[%s4099_s20 + $0xe8] sm:$0xff] %v1988_v25  ;;  %2142 = vst [vmem:[%s4099_s20 + $0xe0] sm:$0xff] %v1987_v57 }
 0x479   : > { %v2935_v50 = vpop.eup %2934  ;;  %2944 = vrcp.f32 %v1842_v51  ;;  %2026 = vmatpush1.xpose.msra.mxu0 %v1987_v57 }
 0x47a   : > { %v1986_v33 = vmul.f32 %v2935_v50, %v3868_v24  ;;  %v1985_v8 = vmul.f32 %v2935_v50, %v3862_v41 }
 0x47b   : > { %v1860_v63 = vpop.xlane.xlu1 %1859  ;;  %v1836_v26 = vpop.xlane.xlu0 %1835 }
 0x47c   : > { %2946 = vrcp.f32 %v1860_v63  ;;  %2027 = vmatprep.subr.mxu0 %v1986_v33  ;;  %2141 = vst [vmem:[%s4099_s20 + $0xd8] sm:$0xff] %v1986_v33  ;;  %2140 = vst [vmem:[%s4099_s20 + $0xd0] sm:$0xff] %v1985_v8 }
 0x47d   : > { %v2937_v9 = vpop.eup %2936  ;;  %2948 = vrcp.f32 %v1836_v26  ;;  %2028 = vmatpush1.xpose.msra.mxu0 %v1985_v8 }
 0x47e   : > { %v1984_v14 = vmul.f32 %v2937_v9, %v3878_v56  ;;  %v1983_v30 = vmul.f32 %v2937_v9, %v3872_v6 }
 0x47f   : > { %v1857_v48 = vpop.xlane.xlu1 %1856 }
 0x480   : > { %2950 = vrcp.f32 %v1857_v48  ;;  %2029 = vmatprep.subr.mxu0 %v1984_v14  ;;  %2139 = vst [vmem:[%s4099_s20 + $0xc8] sm:$0xff] %v1984_v14  ;;  %2138 = vst [vmem:[%s4099_s20 + $0xc0] sm:$0xff] %v1983_v30  ;;  %v4428_v48 = vld [vmem:[#allocation17_spill] sm:$0xff] }
 0x481   : > { %v2939_v41 = vpop.eup %2938  ;;  %2030 = vmatpush1.xpose.msra.mxu0 %v1983_v30 }
 0x482   : > { %v2941_v24 = vpop.eup %2940  ;;  %v1982_v52 = vmul.f32 %v2939_v41, %v3886_v20  ;;  %v1981_v23 = vmul.f32 %v2939_v41, %v3881_v55 }
 0x483   : > { %v1854_v25 = vpop.xlane.xlu1 %1853  ;;  %v1970_v56 = vmul.f32 %v2941_v24, %v3891_v2  ;;  %v4119_v6 = vmul.f32 %v2941_v24, %v3888_v1 }
 0x484   : > { %2952 = vrcp.f32 %v1854_v25  ;;  %2031 = vmatprep.subr.mxu0 %v1982_v52  ;;  %2137 = vst [vmem:[%s4099_s20 + $0xb8] sm:$0xff] %v1982_v52  ;;  %2136 = vst [vmem:[%s4099_s20 + $0xb0] sm:$0xff] %v1981_v23 }
 0x485   : > { %v2943_v57 = vpop.eup %2942  ;;  %2032 = vmatpush1.xpose.msra.mxu0 %v1981_v23  ;;  %2125 = vst [vmem:[%s4099_s20 + $0x58] sm:$0xff] %v1970_v56  ;;  %2124 = vst [vmem:[%s4099_s20 + $0x50] sm:$0xff] %v4119_v6 }
 0x486   : > { %v2945_v55 = vpop.eup %2944  ;;  %v1980_v20 = vmul.f32 %v2943_v57, %v3900_v7  ;;  %v1979_v2 = vmul.f32 %v2943_v57, %v3894_v10 }
 0x487   : > { %v1851_v1 = vpop.xlane.xlu1 %1850  ;;  %v4129_v3 = vmul.f32 %v2945_v55, %v3904_v46  ;;  %v4132_v51 = vmul.f32 %v2945_v55, %v3902_v44 }
 0x488   : > { %2954 = vrcp.f32 %v1851_v1  ;;  %2033 = vmatprep.subr.mxu0 %v1980_v20  ;;  %2135 = vst [vmem:[%s4099_s20 + $0xa8] sm:$0xff] %v1980_v20  ;;  %2134 = vst [vmem:[%s4099_s20 + $0xa0] sm:$0xff] %v1979_v2 }
 0x489   : > { %v2947_v50 = vpop.eup %2946  ;;  %2034 = vmatpush1.xpose.msra.mxu0 %v1979_v2  ;;  %2121 = vst [vmem:[%s4099_s20 + $0x38] sm:$0xff] %v4129_v3  ;;  %2120 = vst [vmem:[%s4099_s20 + $0x30] sm:$0xff] %v4132_v51 }
 0x48a   : > { %v2949_v10 = vpop.eup %2948  ;;  %v1978_v7 = vmul.f32 %v2947_v50, %v3914_v62  ;;  %v1977_v44 = vmul.f32 %v2947_v50, %v3908_v5 }
 0x48b   : > { %v1845_v46 = vpop.xlane.xlu1 %1844  ;;  %v4143_v33 = vmul.f32 %v2949_v10, %v3918_v29  ;;  %v4146_v8 = vmul.f32 %v2949_v10, %v3916_v45 }
 0x48c   : > { %2956 = vrcp.f32 %v1845_v46  ;;  %2035 = vmatprep.subr.mxu0 %v1978_v7  ;;  %2133 = vst [vmem:[%s4099_s20 + $0x98] sm:$0xff] %v1978_v7  ;;  %2132 = vst [vmem:[%s4099_s20 + $0x90] sm:$0xff] %v1977_v44 }
 0x48d   : > { %v2951_v63 = vpop.eup %2950  ;;  %2036 = vmatpush1.xpose.msra.mxu0 %v1977_v44  ;;  %2117 = vst [vmem:[%s4099_s20 + $0x18] sm:$0xff] %v4143_v33  ;;  %2116 = vst [vmem:[%s4099_s20 + $0x10] sm:$0xff] %v4146_v8 }
 0x48e   : > { %v1976_v5 = vmul.f32 %v2951_v63, %v3928_v58  ;;  %v1975_v62 = vmul.f32 %v2951_v63, %v3921_v39 }
 0x48f   : > { %v1839_v29 = vpop.xlane.xlu1 %1838 }
 0x490   : > { %2958 = vrcp.f32 %v1839_v29  ;;  %2037 = vmatprep.subr.mxu0 %v1976_v5  ;;  %2131 = vst [vmem:[%s4099_s20 + $0x88] sm:$0xff] %v1976_v5  ;;  %2130 = vst [vmem:[%s4099_s20 + $0x80] sm:$0xff] %v1975_v62 }
 0x491   : > { %v2953_v45 = vpop.eup %2952  ;;  %2038 = vmatpush1.xpose.msra.mxu0 %v1975_v62 }
 0x492   : > { %v1974_v26 = vmul.f32 %v2953_v45, %v3934_v32  ;;  %v1973_v9 = vmul.f32 %v2953_v45, %v3930_v13  ;;  %v4429_v45 = vld [vmem:[#allocation16_spill] sm:$0xff] }
 0x493   : > { %v1833_v14 = vpop.xlane.xlu1 %1832 }
 0x494   : > { %2960 = vrcp.f32 %v1833_v14  ;;  %2039 = vmatprep.subr.mxu0 %v1974_v26  ;;  %2129 = vst [vmem:[%s4099_s20 + $0x78] sm:$0xff] %v1974_v26  ;;  %2128 = vst [vmem:[%s4099_s20 + $0x70] sm:$0xff] %v1973_v9 }
 0x495   : > { %v2955_v39 = vpop.eup %2954  ;;  %2040 = vmatpush1.xpose.msra.mxu0 %v1973_v9 }
 0x496   : > { %v1972_v58 = vmul.f32 %v2955_v39, %v3940_v21  ;;  %v1971_v30 = vmul.f32 %v2955_v39, %v3936_v16  ;;  %v4432_v39 = vld [vmem:[#allocation13_spill] sm:$0xff] }
 0x498   : > { %2041 = vmatprep.subr.mxu0 %v1972_v58  ;;  %2127 = vst [vmem:[%s4099_s20 + $0x68] sm:$0xff] %v1972_v58  ;;  %2126 = vst [vmem:[%s4099_s20 + $0x60] sm:$0xff] %v1971_v30 }
 0x499   : > { %v2957_v32 = vpop.eup %2956  ;;  %2042 = vmatpush1.xpose.msra.mxu0 %v1971_v30 }
 0x49a   : > { %2043 = vmatprep.subr.mxu0 %v1970_v56  ;;  %v1968_v13 = vmul.f32 %v2957_v32, %v3944_v28  ;;  %v1967_v41 = vmul.f32 %v2957_v32, %v4428_v48 }
 0x49c   : > { %2123 = vst [vmem:[%s4099_s20 + $0x48] sm:$0xff] %v1968_v13  ;;  %2122 = vst [vmem:[%s4099_s20 + $0x40] sm:$0xff] %v1967_v41 }
 0x49d   : > { %v2959_v24 = vpop.eup %2958  ;;  %2044 = vmatpush1.xpose.msra.mxu0 %v4119_v6 }
 0x49e   : > { %2045 = vmatprep.subr.mxu0 %v1968_v13  ;;  %v1964_v16 = vmul.f32 %v2959_v24, %v3954_v60  ;;  %v1963_v52 = vmul.f32 %v2959_v24, %v3950_v43 }
 0x49f   : > { %v1923_v21 = vpop.xlane.xlu1 %1922 }
 0x4a0   : > { %2962 = vrcp.f32 %v1923_v21  ;;  %2119 = vst [vmem:[%s4099_s20 + $0x28] sm:$0xff] %v1964_v16  ;;  %2118 = vst [vmem:[%s4099_s20 + $0x20] sm:$0xff] %v1963_v52  ;;  %v1082_v21 = vpop.f32.mrf.mxu0 }
 0x4a1   : > { %v2961_v23 = vpop.eup %2960  ;;  %2046 = vmatpush1.xpose.msra.mxu0 %v1967_v41 }
 0x4a2   : > { %2047 = vmatprep.subr.mxu0 %v4129_v3  ;;  %v1960_v25 = vmul.f32 %v2961_v23, %v3964_v54  ;;  %v1959_v56 = vmul.f32 %v2961_v23, %v3959_v38  ;;  %v1084_v23 = vpop.f32.mrf.mxu0 }
 0x4a3   : > { %v1917_v28 = vpop.xlane.xlu1 %1916 }
 0x4a4   : > { %2964 = vrcp.f32 %v1917_v28  ;;  %2115 = vst [vmem:[%s4099_s20 + $0x8] sm:$0xff] %v1960_v25  ;;  %2114 = vst [vmem:[%s4099_s20] sm:$0xff] %v1959_v56 }
 0x4a5   : > { %v1926_v6 = vpop.xlane.xlu0 %1925  ;;  %2048 = vmatpush1.xpose.msra.mxu0 %v4132_v51 }
 0x4a6   : > { %2966 = vrcp.f32 %v1926_v6  ;;  %2049 = vmatprep.subr.mxu0 %v1964_v16  ;;  %v4433_v6 = vld [vmem:[#allocation26_spill] sm:$0xff] }
 0x4a7   : > { %v1911_v43 = vpop.xlane.xlu1 %1910 }
 0x4a8   : > { %2968 = vrcp.f32 %v1911_v43 }
 0x4a9   : > { %v1920_v60 = vpop.xlane.xlu0 %1919  ;;  %2050 = vmatpush1.xpose.msra.mxu0 %v1963_v52 }
 0x4aa   : > { %2970 = vrcp.f32 %v1920_v60  ;;  %2051 = vmatprep.subr.mxu0 %v4143_v33  ;;  %v4434_v60 = vld [vmem:[#allocation28_spill] sm:$0xff] }
 0x4ad   : > { %v2963_v57 = vpop.eup %2962  ;;  %v1914_v54 = vpop.xlane.xlu0 %1913  ;;  %2052 = vmatpush1.xpose.msra.mxu0 %v4146_v8 }
 0x4ae   : > { %2972 = vrcp.f32 %v1914_v54  ;;  %v2020_v38 = vmul.f32 %v2963_v57, %v3978_v4  ;;  %v2019_v55 = vmul.f32 %v2963_v57, %v3976_v53  ;;  %2053 = vmatprep.subr.mxu0 %v1960_v25 }
 0x4b0   : > { %2175 = vst [vmem:[%s4099_s20 + $0x1e8] sm:$0xff] %v2020_v38  ;;  %2174 = vst [vmem:[%s4099_s20 + $0x1e0] sm:$0xff] %v2019_v55 }
 0x4b1   : > { %v2965_v20 = vpop.eup %2964  ;;  %v1908_v2 = vpop.xlane.xlu0 %1907  ;;  %2054 = vmatpush1.xpose.msra.mxu0 %v1959_v56 }
 0x4b2   : > { %2974 = vrcp.f32 %v1908_v2  ;;  %v2016_v1 = vmul.f32 %v2965_v20, %v3986_v15  ;;  %v2015_v3 = vmul.f32 %v2965_v20, %v3984_v49  ;;  %v4437_v2 = vld [vmem:[#allocation22_spill] sm:$0xff] }
 0x4b3   : > { %v2967_v51 = vpop.eup %2966  ;;  %v1905_v4 = vpop.xlane.xlu1 %1904 }
 0x4b4   : > { %2976 = vrcp.f32 %v1905_v4  ;;  %v2022_v53 = vmul.f32 %v2967_v51, %v3992_v35  ;;  %v2021_v50 = vmul.f32 %v2967_v51, %v3988_v12  ;;  %2171 = vst [vmem:[%s4099_s20 + $0x1c8] sm:$0xff] %v2016_v1  ;;  %2170 = vst [vmem:[%s4099_s20 + $0x1c0] sm:$0xff] %v2015_v3  ;;  %v1088_v4 = vpop.f32.mrf.mxu0 }
 0x4b5   : > { %v2969_v10 = vpop.eup %2968 }
 0x4b6   : > { %2055 = vmatprep.subr.mxu0 %v2022_v53  ;;  %2177 = vst [vmem:[%s4099_s20 + $0x1f8] sm:$0xff] %v2022_v53  ;;  %2176 = vst [vmem:[%s4099_s20 + $0x1f0] sm:$0xff] %v2021_v50  ;;  %v2012_v49 = vmul.f32 %v2969_v10, %v4000_v19  ;;  %v2011_v15 = vmul.f32 %v2969_v10, %v3996_v0  ;;  %v1090_v53 = vpop.f32.mrf.mxu0 }
 0x4b7   : > { %v2971_v7 = vpop.eup %2970  ;;  %2056 = vmatpush2.xpose.msra.mxu0 %v2021_v50  ;;  %v1902_v44 = vpop.xlane.xlu0 %1901 }
 0x4b8   : > { %2057 = vmatprep.subr.mxu0 %v2020_v38  ;;  %2978 = vrcp.f32 %v1902_v44  ;;  %v2018_v12 = vmul.f32 %v2971_v7, %v4006_v61  ;;  %v2017_v35 = vmul.f32 %v2971_v7, %v4002_v34  ;;  %2167 = vst [vmem:[%s4099_s20 + $0x1a8] sm:$0xff] %v2012_v49  ;;  %2166 = vst [vmem:[%s4099_s20 + $0x1a0] sm:$0xff] %v2011_v15  ;;  %v4436_v38 = vld [vmem:[#allocation27_spill] sm:$0xff] }
 0x4ba   : > { %2173 = vst [vmem:[%s4099_s20 + $0x1d8] sm:$0xff] %v2018_v12  ;;  %2172 = vst [vmem:[%s4099_s20 + $0x1d0] sm:$0xff] %v2017_v35 }
 0x4bb   : > { %v2973_v46 = vpop.eup %2972  ;;  %2058 = vmatpush2.xpose.msra.mxu0 %v2019_v55  ;;  %v1899_v19 = vpop.xlane.xlu1 %1898 }
 0x4bc   : > { %2059 = vmatprep.subr.mxu0 %v2018_v12  ;;  %2980 = vrcp.f32 %v1899_v19  ;;  %v2014_v0 = vmul.f32 %v2973_v46, %v4014_v27  ;;  %v2013_v33 = vmul.f32 %v2973_v46, %v4010_v47 }
 0x4be   : > { %2169 = vst [vmem:[%s4099_s20 + $0x1b8] sm:$0xff] %v2014_v0  ;;  %2168 = vst [vmem:[%s4099_s20 + $0x1b0] sm:$0xff] %v2013_v33 }
 0x4bf   : > { %v2975_v61 = vpop.eup %2974  ;;  %2060 = vmatpush2.xpose.msra.mxu0 %v2017_v35  ;;  %v1896_v34 = vpop.xlane.xlu0 %1895 }
 0x4c0   : > { %2061 = vmatprep.subr.mxu0 %v2016_v1  ;;  %2982 = vrcp.f32 %v1896_v34  ;;  %v2010_v8 = vmul.f32 %v2975_v61, %v4022_v59  ;;  %v2009_v63 = vmul.f32 %v2975_v61, %v4020_v40  ;;  %v4430_v40 = vld [vmem:[#allocation15_spill] sm:$0xff] }
 0x4c1   : > { %v2977_v5 = vpop.eup %2976 }
 0x4c2   : > { %2165 = vst [vmem:[%s4099_s20 + $0x198] sm:$0xff] %v2010_v8  ;;  %2164 = vst [vmem:[%s4099_s20 + $0x190] sm:$0xff] %v2009_v63  ;;  %v2008_v27 = vmul.f32 %v2977_v5, %v4030_v37  ;;  %v2007_v47 = vmul.f32 %v2977_v5, %v4028_v36  ;;  %v4431_v37 = vld [vmem:[#allocation14_spill] sm:$0xff] }
 0x4c3   : > { %2062 = vmatpush2.xpose.msra.mxu0 %v2015_v3  ;;  %v1893_v62 = vpop.xlane.xlu1 %1892  ;;  %v4438_v3 = vld [vmem:[#allocation25_spill] sm:$0xff] }
 0x4c4   : > { %2063 = vmatprep.subr.mxu0 %v2014_v0  ;;  %2984 = vrcp.f32 %v1893_v62  ;;  %2163 = vst [vmem:[%s4099_s20 + $0x188] sm:$0xff] %v2008_v27  ;;  %2162 = vst [vmem:[%s4099_s20 + $0x180] sm:$0xff] %v2007_v47 }
 0x4c5   : > { %v2979_v29 = vpop.eup %2978 }
 0x4c6   : > { %v2006_v59 = vmul.f32 %v2979_v29, %v4429_v45  ;;  %v2005_v26 = vmul.f32 %v2979_v29, %v4430_v40 }
 0x4c7   : > { %2064 = vmatpush2.xpose.msra.mxu0 %v2013_v33  ;;  %v1890_v9 = vpop.xlane.xlu0 %1889 }
 0x4c8   : > { %2065 = vmatprep.subr.mxu0 %v2012_v49  ;;  %2986 = vrcp.f32 %v1890_v9  ;;  %2161 = vst [vmem:[%s4099_s20 + $0x178] sm:$0xff] %v2006_v59  ;;  %2160 = vst [vmem:[%s4099_s20 + $0x170] sm:$0xff] %v2005_v26 }
 0x4c9   : > { %v2981_v36 = vpop.eup %2980 }
 0x4ca   : > { %v2004_v14 = vmul.f32 %v2981_v36, %v4431_v37  ;;  %v2003_v58 = vmul.f32 %v2981_v36, %v4432_v39 }
 0x4cb   : > { %2066 = vmatpush2.xpose.msra.mxu0 %v2011_v15  ;;  %v1887_v30 = vpop.xlane.xlu1 %1886 }
 0x4cc   : > { %2067 = vmatprep.subr.mxu0 %v2010_v8  ;;  %2988 = vrcp.f32 %v1887_v30  ;;  %2159 = vst [vmem:[%s4099_s20 + $0x168] sm:$0xff] %v2004_v14  ;;  %2158 = vst [vmem:[%s4099_s20 + $0x160] sm:$0xff] %v2003_v58 }
 0x4cd   : > { %v2983_v32 = vpop.eup %2982 }
 0x4ce   : > { %v2002_v13 = vmul.f32 %v2983_v32, %v4054_v22  ;;  %v2001_v48 = vmul.f32 %v2983_v32, %v4052_v31 }
 0x4cf   : > { %2068 = vmatpush2.xpose.msra.mxu0 %v2009_v63  ;;  %v1884_v41 = vpop.xlane.xlu0 %1883 }
 0x4d0   : > { %2069 = vmatprep.subr.mxu0 %v2008_v27  ;;  %2990 = vrcp.f32 %v1884_v41  ;;  %2157 = vst [vmem:[%s4099_s20 + $0x158] sm:$0xff] %v2002_v13  ;;  %2156 = vst [vmem:[%s4099_s20 + $0x150] sm:$0xff] %v2001_v48 }
 0x4d1   : > { %v2985_v24 = vpop.eup %2984 }
 0x4d2   : > { %v2000_v16 = vmul.f32 %v2985_v24, %v4062_v18  ;;  %v1999_v52 = vmul.f32 %v2985_v24, %v4060_v42 }
 0x4d3   : > { %2070 = vmatpush2.xpose.msra.mxu0 %v2007_v47  ;;  %v1881_v22 = vpop.xlane.xlu1 %1880 }
 0x4d4   : > { %2071 = vmatprep.subr.mxu0 %v2006_v59  ;;  %2992 = vrcp.f32 %v1881_v22  ;;  %2155 = vst [vmem:[%s4099_s20 + $0x148] sm:$0xff] %v2000_v16  ;;  %2154 = vst [vmem:[%s4099_s20 + $0x140] sm:$0xff] %v1999_v52 }
 0x4d5   : > { %v2987_v31 = vpop.eup %2986 }
 0x4d6   : > { %v1998_v28 = vmul.f32 %v2987_v31, %v4068_v11  ;;  %v1997_v25 = vmul.f32 %v2987_v31, %v4066_v17  ;;  %v4435_v11 = vld [vmem:[#allocation24_spill] sm:$0xff] }
 0x4d7   : > { %2072 = vmatpush2.xpose.msra.mxu0 %v2005_v26  ;;  %v1003_v56 = vpop.permute.xlu0 %1002  ;;  %v1008_v50 = vpop.permute.xlu1 %1007 }
 0x4d8   : > { %2073 = vmatprep.subr.mxu0 %v2004_v14  ;;  %2153 = vst [vmem:[%s4099_s20 + $0x138] sm:$0xff] %v1998_v28  ;;  %2152 = vst [vmem:[%s4099_s20 + $0x130] sm:$0xff] %v1997_v25  ;;  %v1085_v42 = vadd.f32 %v1084_v23, %v1003_v56  ;;  %v1091_v10 = vadd.f32 %v1090_v53, %v1008_v50  ;;  %v1083_v49 = vadd.f32 %v1082_v21, %v1003_v56 }
 0x4d9   : > { %v2989_v18 = vpop.eup %2988  ;;  %v1089_v15 = vadd.f32 %v1088_v4, %v1008_v50 }
 0x4da   : > { %v1996_v43 = vmul.f32 %v2989_v18, %v4433_v6  ;;  %v1995_v57 = vmul.f32 %v2989_v18, %v4434_v60  ;;  %2087 = vmatprep.mubr.f32.mxu0 %v1085_v42 }
 0x4db   : > { %2074 = vmatpush2.xpose.msra.mxu0 %v2003_v58 }
 0x4dc   : > { %2075 = vmatprep.subr.mxu0 %v2002_v13  ;;  %2151 = vst [vmem:[%s4099_s20 + $0x128] sm:$0xff] %v1996_v43  ;;  %2150 = vst [vmem:[%s4099_s20 + $0x120] sm:$0xff] %v1995_v57 }
 0x4dd   : > { %v2991_v17 = vpop.eup %2990 }
 0x4de   : > { %v1994_v54 = vmul.f32 %v2991_v17, %v4435_v11  ;;  %v1993_v55 = vmul.f32 %v2991_v17, %v4436_v38 }
 0x4df   : > { %2076 = vmatpush2.xpose.msra.mxu0 %v2001_v48 }
 0x4e0   : > { %2077 = vmatprep.subr.mxu0 %v2000_v16  ;;  %2149 = vst [vmem:[%s4099_s20 + $0x118] sm:$0xff] %v1994_v54  ;;  %2148 = vst [vmem:[%s4099_s20 + $0x110] sm:$0xff] %v1993_v55 }
 0x4e1   : > { %v2993_v20 = vpop.eup %2992 }
 0x4e2   : > { %v1992_v1 = vmul.f32 %v2993_v20, %v4437_v2  ;;  %v1991_v51 = vmul.f32 %v2993_v20, %v4438_v3 }
 0x4e3   : > { %2078 = vmatpush2.xpose.msra.mxu0 %v1999_v52 }
 0x4e4   : > { %2079 = vmatprep.subr.mxu0 %v1998_v28  ;;  %2147 = vst [vmem:[%s4099_s20 + $0x108] sm:$0xff] %v1992_v1  ;;  %2146 = vst [vmem:[%s4099_s20 + $0x100] sm:$0xff] %v1991_v51 }
 0x4e7   : > { %2080 = vmatpush2.xpose.msra.mxu0 %v1997_v25 }
 0x4e8   : > { %2081 = vmatprep.subr.mxu0 %v1996_v43 }
 0x4eb   : > { %2082 = vmatpush2.xpose.msra.mxu0 %v1995_v57 }
 0x4ec   : > { %2083 = vmatprep.subr.mxu0 %v1994_v54 }
 0x4ef   : > { %2084 = vmatpush2.xpose.msra.mxu0 %v1993_v55 }
 0x4f0   : > { %2085 = vmatprep.subr.mxu0 %v1992_v1 }
 0x4f3   : > { %2086 = vmatpush2.xpose.msra.mxu0 %v1991_v51 }
 0x4f6   : > { %2088 = vmatmul.mubr.f32.vlgmr.msra.gmra.mxu0 %v1083_v49 }
 0x4f7   : > { %2093 = vmatprep.mubr.f32.mxu0 %v1091_v10 }
 0x4fa   : > { %2094 = vmatmul.mubr.f32.gmra.mxu0 %v1089_v15 }
 0x4fb   : > { %3039 = shalt.err (!%p3036_p10)
}
 0x4fc   : > { %s3040_s20 = scalar_lea.hbm %s4252_s21, 8192  ;;  %s3044_s17 = scalar_lea.hbm %s4347_s9, 16384 }
 0x4fd   : > { %p3041_p0 = scmp.ne.s32.totalorder %s4252_s21, %s3040_s20  ;;  %p3045_p1 = scmp.lt.s32.totalorder %s4252_s21, %s4347_s9 }
 0x4fe   : > { %p3046_p3 = scmp.lt.s32.totalorder %s3044_s17, %s3040_s20 }
 0x4ff   : > { %p3042_p2 = pnand %p3041_p0, %p4439_p12 }
 0x500   : > { %p3047_p6 = por %p3046_p3, %p3045_p1 }
 0x501   : > { %p3043_p9 = pneg %p3042_p2 }
 0x503   : > { %p3048_p11 = pnand %p3047_p6, %p3043_p9 }
 0x505   : > { %3051 = shalt.err (!%p3048_p11)
}
 0x506   : > { %s3128_s30 = smov 256   ;;  %s3129_s18 = smov 16   ;;  %v2994_v46 = vld [vmem:[%s3287_s28] sm:$0xff]  ;;  %v2995_v61 = vld [vmem:[%s3287_s28 + $0x8] sm:$0xff]  ;;  %v2996_v5 = vld [vmem:[%s3287_s28 + $0x10] sm:$0xff] }
 0x507   : > { %2746 = dma.vmem_to_hbm [thread:$0]  (%p4439_p12), %s4254_s10, 8192, %s4252_s21, %s2184_s24, %s3128_s30, %s3128_s30, %s3129_s18  }
 0x508   : > { %s2100_s26 = sld [smem:[#allocation2]]  ;;  %s4440_s27 = sshll.u32 %s3281_s19, 5  ;;  %v2997_v62 = vld [vmem:[%s3287_s28 + $0x18] sm:$0xff] }
 0x509   : > { %s355_s20 = scalar_lea.vmem [#allocation6], %s4440_s27  ;;  %s2469_s10 = sshll.u32 %s3205_s7, 9 }
 0x50a   : > { %s2197_s29 = sshll.u32 %s355_s20, 4  ;;  %s4294_s15 = scalar_lea.hbm %s4346_s8, %s2469_s10  ;;  %s4288_s29 = int_to_ptr.vmem [resolvable:$true] %s2197_s29 }
 0x50b   : > { %s2179_s17 = scalar_lea.sflag [#allocation5], %s3281_s19  ;;  %s3052_s7 = scalar_lea.vmem %s4288_s29, 512 }
 0x50c   : > { %p3053_p13 = scmp.ne.s32.totalorder %s4288_s29, %s3052_s7  ;;  %s3130_s25 = smov [#allocation6]  }
 0x50e   : > { %v2101_v7 = vstv %s2100_s26  ;;  %p3054_p4 = pnand %p3053_p13, %p4439_p12  ;;  %s3056_s26 = sshll.u32 %s3130_s25, 4  ;;  %s3057_s26 = int_to_ptr.vmem [resolvable:$false] %s3056_s26 }
 0x50f   : > { %s3058_s27 = scalar_lea.vmem %s3057_s26, 1024  ;;  %p3059_p7 = scmp.lt.s32.totalorder %s4288_s29, %s3057_s26 }
 0x510   : > { %p3055_p5 = pneg %p3054_p4  ;;  %p3060_p8 = scmp.lt.s32.totalorder %s3058_s27, %s3052_s7 }
 0x512   : > { %p3061_p10 = por %p3060_p8, %p3059_p7 }
 0x514   : > { %p3062_p0 = pnand %p3061_p10, %p3055_p5 }
 0x5b6   : > { %v2089_v44 = vpop.f32.mrf.mxu0 }
 0x5b7   : > { %v2102_v12 = vmul.f32 %v2101_v7, %v2089_v44 }
 0x5b8   : > { %v2091_v35 = vpop.f32.mrf.mxu0 }
 0x5b9   : > { %v2106_v19 = vadd.f32 %v2994_v46, %v2102_v12  ;;  %v2103_v0 = vmul.f32 %v2101_v7, %v2091_v35 }
 0x5ba   : > { %v2095_v33 = vpop.f32.mrf.mxu0 }
 0x5bb   : > { %2110 = vst [vmem:[%s355_s20] sm:$0xff] %v2106_v19  ;;  %v2107_v34 = vadd.f32 %v2995_v61, %v2103_v0  ;;  %v2104_v8 = vmul.f32 %v2101_v7, %v2095_v33 }
 0x5bc   : > { %v2097_v63 = vpop.f32.mrf.mxu0 }
 0x5bd   : > { %2111 = vst [vmem:[%s355_s20 + $0x8] sm:$0xff] %v2107_v34  ;;  %v2108_v27 = vadd.f32 %v2996_v5, %v2104_v8  ;;  %v2105_v47 = vmul.f32 %v2101_v7, %v2097_v63 }
 0x5bf   : > { %2112 = vst [vmem:[%s355_s20 + $0x10] sm:$0xff] %v2108_v27  ;;  %v2109_v29 = vadd.f32 %v2997_v62, %v2105_v47 }
 0x5c1   : > { %2113 = vst [vmem:[%s355_s20 + $0x18] sm:$0xff] %v2109_v29 }
 0x5c2   : > { %3065 = shalt.err (!%p3062_p0)
}
 0x5c3   : > { %s3066_s28 = scalar_lea.hbm %s4294_s15, 512  ;;  %s3070_s10 = scalar_lea.hbm %s4346_s8, 1024 }
 0x5c4   : > { %p3067_p2 = scmp.ne.s32.totalorder %s4294_s15, %s3066_s28  ;;  %p3071_p3 = scmp.lt.s32.totalorder %s4294_s15, %s4346_s8 }
 0x5c5   : > { %p3072_p6 = scmp.lt.s32.totalorder %s3070_s10, %s3066_s28 }
 0x5c6   : > { %p3068_p9 = pnand %p3067_p2, %p4439_p12 }
 0x5c7   : > { %p3073_p11 = por %p3072_p6, %p3071_p3 }
 0x5c8   : > { %p3069_p1 = pneg %p3068_p9 }
 0x5ca   : > { %p3074_p13 = pnand %p3073_p11, %p3069_p1 }
 0x5cc   : > { %3077 = shalt.err (!%p3074_p13)
}
 0x5cd   : > { %2745 = dma.vmem_to_hbm [thread:$0]  (%p4439_p12), %s4288_s29, 512, %s4294_s15, %s2179_s17, %s3128_s30, %s3128_s30, %s3129_s18  }
 0x5ce PF: > { %s2228_s7 = sand.u32 1, %s3108_s11   ;;  %p4441_p4 = scmp.ne.s32.totalorder %s4382_s23, 0 }
 0x5cf   : > { %p4442_p5 = scmp.ge.s32.totalorder %s3120_s14, 2  ;;  %s2229_s25 = scalar_lea.sflag [#allocation5], %s2228_s7 }
 0x5d1   : > { %p2754_p7 = pnand %p4442_p5, %p4441_p4 }
 0x5d3   : > { %p2755_p8 = pneg %p2754_p7 }
 0x5d5   : > { %3099 = dma.done.wait (%p2755_p8), %s2229_s25, 512  }
 0x5d6   : > { %3101 = vsyncadd (%p2755_p8), %s2229_s25, 4294966784  ;;  %s2238_s26 = scalar_lea.sflag [#allocation8], %s2228_s7 }
 0x5d7   : > { %3103 = dma.done.wait (%p2755_p8), %s2238_s26, 8192  }
 0x5d8   : > { %3105 = vsyncadd (%p2755_p8), %s2238_s26, 4294959104  ;;  %s4443_s22 = sld [smem:[#allocation12_spill]]  ;;  %p27_p12 = scmp.ge.s32.totalorder %s3209_s16, 4  }
 0x5d9   : > { %s4444_s11 = smov %s3112_s12  ;;  %s4445_s12 = smov %s3116_s13 }
 0x5da   : > { %s4447_s14 = smov %s3209_s16  ;;  %29 = sbr.rel (!%p27_p12) target bundleno = 9 (0x9), region = 114 }
 0x5de   : > { %s4446_s13 = smov %s4443_s22 }
 0x5df   :  { %2243 = vsyncpa [#allocation4], 1 }
 0x5e0   :  { %2245 = vsyncpa [#allocation4 + $0x1], 1 }
 0x5e1   :  { %2246 = vsyncpa [#allocation5], 1 }
 0x5e2   :  { %2248 = vsyncpa [#allocation5 + $0x1], 1 }
 0x5e3   :  { %2249 = vsyncpa [#allocation8], 1 }
 0x5e4   :  { %2251 = vsyncpa [#allocation8 + $0x1], 1 }

</bundles_post_ra>
